<compile_context>
chip_gen: v7x
topology: tpu7x:2x2x1
jax: 0.10.0
libtpu: 0.0.40
codegen_flags: <defaults>
</compile_context>

<pallas_src>
import functools

import jax
import jax.numpy as jnp
import numpy as np
from jax.experimental import pallas as pl
from jax.experimental.pallas import tpu as pltpu

LRELU_SLOPE = 0.2
BN_EPS = 1e-5


# ----------------------------------------------------------------------------
# Fused Pallas kernel
# ----------------------------------------------------------------------------
def _cae_fused_kernel(x_ref, w1, p1, w2, p2, w3, p3, w4, p4, w5, p5, w6, p6,
                      out_ref, *, N, L, K, train):
    """Fused CAE forward.

    x_ref            : (N, 3, L)        VMEM, f32
    w{i}             : (Cout, K*Cin)    VMEM, f32   (pre-reshaped; deconv already flipped)
    p{i}             : (Cout, 3)        VMEM, f32   columns = [bias, gamma, beta]
    out_ref (eval)   : (N, 3, L)        VMEM, f32
    out_ref (train)  : (1, 1)           SMEM, f32   (MSE loss)
    """
    # Flatten the input to a lane-dense (C, N*L) slab (lane/minor-dim concat only).
    x2 = jnp.concatenate([x_ref[n] for n in range(N)], axis=1).astype(jnp.float32)

    def layer(act, Lin, w_ref, p_ref, apply_bn):
        Cout, KC = w_ref.shape
        Cin = KC // K
        Lout = Lin - K + 1
        w = w_ref[...]                      # (Cout, K*Cin)
        p = p_ref[...]                      # (Cout, 3)

        def rhs_k(k):
            # shifted window k, stacked across batch along lanes -> (Cin, N*Lout)
            return jnp.concatenate(
                [act[:, n * Lin + k: n * Lin + k + Lout] for n in range(N)],
                axis=1)

        if Cin % 8 == 0:
            # Single im2col matmul per layer (row order k*Cin + ci matches the
            # pre-reshaped weights).  Sublane concat offsets are 8-aligned.
            col = jnp.concatenate([rhs_k(k) for k in range(K)], axis=0)  # (K*Cin, N*Lout)
            y = jnp.dot(w, col, preferred_element_type=jnp.float32)      # (Cout, N*Lout)
        else:
            # Ragged Cin (first layer, Cin=3): K lane-sliced dots instead of a
            # sublane-unaligned concatenation.
            y = jnp.zeros((Cout, N * Lout), jnp.float32)
            for k in range(K):
                y = y + jnp.dot(w[:, k * Cin:(k + 1) * Cin], rhs_k(k),
                                preferred_element_type=jnp.float32)

        y = y + p[:, 0:1]                                                # bias
        if apply_bn:
            # BatchNorm1d in training mode: batch stats over (N, Lout) per channel.
            mean = jnp.mean(y, axis=1, keepdims=True)
            var = jnp.mean((y - mean) ** 2, axis=1, keepdims=True)
            y = (y - mean) * jax.lax.rsqrt(var + BN_EPS)
            y = y * p[:, 1:2] + p[:, 2:3]
            y = jnp.where(y >= 0, y, LRELU_SLOPE * y)                    # LeakyReLU(0.2)
        return y, Lout

    def pad(act, Lin, P):
        # Per-batch zero padding (ConvTranspose rewrite), done purely in VMEM values.
        z = jnp.zeros((act.shape[0], P), jnp.float32)
        segs = []
        for n in range(N):
            segs += [z, act[:, n * Lin:(n + 1) * Lin], z]
        return jnp.concatenate(segs, axis=1), Lin + 2 * P

    # encoder
    h, Lc = layer(x2, L, w1, p1, True)
    h, Lc = layer(h, Lc, w2, p2, True)
    h, Lc = layer(h, Lc, w3, p3, True)
    # decoder (transpose conv == conv on padded input with flipped weights)
    h, Lc = pad(h, Lc, K - 1)
    h, Lc = layer(h, Lc, w4, p4, True)
    h, Lc = pad(h, Lc, K - 1)
    h, Lc = layer(h, Lc, w5, p5, True)
    h, Lc = pad(h, Lc, K - 1)
    out2, _ = layer(h, Lc, w6, p6, False)      # last layer: no BN / no ReLU

    if train:
        d = x2 - out2
        out_ref[0, 0] = jnp.sum(d * d) * (1.0 / float(d.size))
    else:
        for n in range(N):
            out_ref[n] = out2[:, n * L:(n + 1) * L].astype(out_ref.dtype)


# ----------------------------------------------------------------------------
# Wrapper
# ----------------------------------------------------------------------------
_LAYERS = ('enc1', 'enc2', 'enc3', 'dec1', 'dec2', 'dec3')


def cae_forward(x, prepped_params, mode='train'):
    """x: (N, 3, L) f32; prepped_params: output of prepare_params()."""
    N, C, L = x.shape
    flat = []
    for name in _LAYERS:
        w_eff, p = prepped_params[name]
        flat += [w_eff, p]

    train = (mode == 'train')
    if train:
        out_shape = jax.ShapeDtypeStruct((1, 1), jnp.float32)
        out_spec = pl.BlockSpec(memory_space=pltpu.MemorySpace.SMEM)
    else:
        out_shape = jax.ShapeDtypeStruct((N, C, L), jnp.float32)
        out_spec = pl.BlockSpec(memory_space=pltpu.MemorySpace.VMEM)

    kern = functools.partial(_cae_fused_kernel, N=N, L=L, K=3, train=train)
    out = pl.pallas_call(
        kern,
        out_shape=out_shape,
        in_specs=[pl.BlockSpec(memory_space=pltpu.MemorySpace.VMEM)] * (1 + len(flat)),
        out_specs=out_spec,
    )(x, *flat)
    return out[0, 0] if train else out


# ----------------------------------------------------------------------------
# One-time parameter preparation (hoisted out of the forward pass)
# ----------------------------------------------------------------------------
def prepare_params(raw_params):
    """Raw PyTorch-style params -> kernel-ready params.

    Conv layers     : w (Cout, Cin, K) -> (Cout, K*Cin)  row order k*Cin + ci
    Deconv layers   : w_t (Cin, Cout, K) flipped/transposed to an equivalent conv
                      weight first, then reshaped the same way.
    bias/gamma/beta : packed into a single (Cout, 3) slab per layer.
    """
    def pack(w_conv, b, g, be):
        Cout, Cin, K = w_conv.shape
        w_eff = jnp.transpose(w_conv, (0, 2, 1)).reshape(Cout, K * Cin)
        return w_eff, jnp.stack([b, g, be], axis=1)

    prepped = {}
    for name in ('enc1', 'enc2', 'enc3'):
        w, b, g, be = raw_params[name]
        prepped[name] = pack(w, b, g, be)
    for name in ('dec1', 'dec2', 'dec3'):
        w_t, b, g, be = raw_params[name]
        w_conv = jnp.flip(jnp.transpose(w_t, (1, 0, 2)), axis=2)   # (Cout, Cin, K)
        prepped[name] = pack(w_conv, b, g, be)
    return prepped


# ----------------------------------------------------------------------------
# Deterministic parameter init (PyTorch default-style uniform fan-in init)
# ----------------------------------------------------------------------------
def init_params(key):
    def conv_p(k, cin, cout, ks):
        k1, k2 = jax.random.split(k)
        s = 1.0 / np.sqrt(cin * ks)
        w = jax.random.uniform(k1, (cout, cin, ks), jnp.float32, -s, s)
        b = jax.random.uniform(k2, (cout,), jnp.float32, -s, s)
        return w, b, jnp.ones((cout,), jnp.float32), jnp.zeros((cout,), jnp.float32)

    def tconv_p(k, cin, cout, ks):
        k1, k2 = jax.random.split(k)
        s = 1.0 / np.sqrt(cout * ks)
        w = jax.random.uniform(k1, (cin, cout, ks), jnp.float32, -s, s)
        b = jax.random.uniform(k2, (cout,), jnp.float32, -s, s)
        return w, b, jnp.ones((cout,), jnp.float32), jnp.zeros((cout,), jnp.float32)

    ks = jax.random.split(key, 6)
    return {
        'enc1': conv_p(ks[0], 3, 16, 3),
        'enc2': conv_p(ks[1], 16, 32, 3),
        'enc3': conv_p(ks[2], 32, 64, 3),
        'dec1': tconv_p(ks[3], 64, 32, 3),
        'dec2': tconv_p(ks[4], 32, 16, 3),
        'dec3': tconv_p(ks[5], 16, 3, 3),
    }


# ----------------------------------------------------------------------------
# Pure-JAX reference (same math, raw params) used to verify the Pallas lowering
# ----------------------------------------------------------------------------
def _ref_conv(x, w, b):
    N, Cin, L = x.shape
    Cout, _, K = w.shape
    Lout = L - K + 1
    out = jnp.zeros((N, Cout, Lout), jnp.float32)
    for k in range(K):
        out = out + jnp.einsum('oc,ncl->nol', w[:, :, k], x[:, :, k:k + Lout])
    return out + b[None, :, None]


def _ref_bn_lrelu(y, gamma, beta):
    mean = jnp.mean(y, axis=(0, 2), keepdims=True)
    var = jnp.mean((y - mean) ** 2, axis=(0, 2), keepdims=True)
    yn = (y - mean) * jax.lax.rsqrt(var + BN_EPS)
    yn = yn * gamma[None, :, None] + beta[None, :, None]
    return jnp.where(yn >= 0, yn, LRELU_SLOPE * yn)


def _ref_block(x, w, b, g, be, bn=True):
    y = _ref_conv(x, w, b)
    return _ref_bn_lrelu(y, g, be) if bn else y


def cae_forward_ref(x, params, mode='train'):
    def as_conv(p):
        w, b, g, be = p
        return jnp.flip(jnp.transpose(w, (1, 0, 2)), axis=2), b, g, be

    h = _ref_block(x, *params['enc1'])
    h = _ref_block(h, *params['enc2'])
    h = _ref_block(h, *params['enc3'])
    pad = lambda a: jnp.pad(a, ((0, 0), (0, 0), (2, 2)))
    h = _ref_block(pad(h), *as_conv(params['dec1']))
    h = _ref_block(pad(h), *as_conv(params['dec2']))
    out = _ref_block(pad(h), *as_conv(params['dec3']), bn=False)
    if mode == 'train':
        return jnp.mean((x - out) ** 2)
    return out


# ----------------------------------------------------------------------------
if __name__ == "__main__":
    key = jax.random.PRNGKey(0)
    kx, kp = jax.random.split(key)

    # small deterministic input: batch=2, channels=3 (module requires 3), length=16
    x = jax.random.normal(kx, (2, 3, 16), jnp.float32)
    raw_params = init_params(kp)
    params = prepare_params(raw_params)   # one-time weight transform / packing

    # eval path: reconstruction output (single fused pallas_call)
    out = jax.block_until_ready(cae_forward(x, params, mode='eval'))
    # train path: MSE loss only (single fused pallas_call, scalar SMEM output)
    loss = jax.block_until_ready(cae_forward(x, params, mode='train'))

    # verify against pure-JAX reference of the same math
    out_ref = cae_forward_ref(x, raw_params, mode='eval')
    loss_ref = cae_forward_ref(x, raw_params, mode='train')
    np.testing.assert_allclose(np.asarray(out), np.asarray(out_ref), rtol=2e-4, atol=2e-4)
    np.testing.assert_allclose(np.asarray(loss), np.asarray(loss_ref), rtol=2e-4, atol=2e-4)
    assert out.shape == x.shape

    print("KERNEL_OK")
</pallas_src>

<mosaic_0001>
module attributes {stable_mosaic.version = 11 : i64} {
  func.func @_cae_fused_kernel(%arg0: memref<2x3x16xf32, #tpu.memory_space<vmem>>, %arg1: memref<16x9xf32, #tpu.memory_space<vmem>>, %arg2: memref<16x3xf32, #tpu.memory_space<vmem>>, %arg3: memref<32x48xf32, #tpu.memory_space<vmem>>, %arg4: memref<32x3xf32, #tpu.memory_space<vmem>>, %arg5: memref<64x96xf32, #tpu.memory_space<vmem>>, %arg6: memref<64x3xf32, #tpu.memory_space<vmem>>, %arg7: memref<32x192xf32, #tpu.memory_space<vmem>>, %arg8: memref<32x3xf32, #tpu.memory_space<vmem>>, %arg9: memref<16x96xf32, #tpu.memory_space<vmem>>, %arg10: memref<16x3xf32, #tpu.memory_space<vmem>>, %arg11: memref<3x48xf32, #tpu.memory_space<vmem>>, %arg12: memref<3x3xf32, #tpu.memory_space<vmem>>, %arg13: memref<2x3x16xf32, #tpu.memory_space<vmem>>) attributes {dimension_semantics = [], scalar_prefetch = 0 : i64, scratch_operands = 0 : i64, tpu.core_type = #tpu.core_type<tc>} {
    %c0 = arith.constant 0 : index
    %c0_0 = arith.constant 0 : index
    %c0_1 = arith.constant 0 : index
    %0 = vector.load %arg0[%c0, %c0_0, %c0_1] : memref<2x3x16xf32, #tpu.memory_space<vmem>>, vector<1x3x16xf32>
    %1 = vector.shape_cast %0 : vector<1x3x16xf32> to vector<3x16xf32>
    %c1 = arith.constant 1 : index
    %c0_2 = arith.constant 0 : index
    %c0_3 = arith.constant 0 : index
    %2 = vector.load %arg0[%c1, %c0_2, %c0_3] : memref<2x3x16xf32, #tpu.memory_space<vmem>>, vector<1x3x16xf32>
    %3 = vector.shape_cast %2 : vector<1x3x16xf32> to vector<3x16xf32>
    %4 = tpu.concatenate %1, %3 in 1 : vector<3x16xf32>, vector<3x16xf32> -> vector<3x32xf32>
    %c0_4 = arith.constant 0 : index
    %c0_5 = arith.constant 0 : index
    %5 = vector.load %arg1[%c0_4, %c0_5] : memref<16x9xf32, #tpu.memory_space<vmem>>, vector<16x9xf32>
    %c0_6 = arith.constant 0 : index
    %c0_7 = arith.constant 0 : index
    %6 = vector.load %arg2[%c0_6, %c0_7] : memref<16x3xf32, #tpu.memory_space<vmem>>, vector<16x3xf32>
    %cst = arith.constant 0.000000e+00 : f32
    %7 = vector.broadcast %cst : f32 to vector<16x28xf32>
    %8 = vector.extract_strided_slice %5 {offsets = [0, 0], sizes = [16, 3], strides = [1, 1]} : vector<16x9xf32> to vector<16x3xf32>
    %9 = vector.extract_strided_slice %4 {offsets = [0, 0], sizes = [3, 14], strides = [1, 1]} : vector<3x32xf32> to vector<3x14xf32>
    %10 = vector.extract_strided_slice %4 {offsets = [0, 16], sizes = [3, 14], strides = [1, 1]} : vector<3x32xf32> to vector<3x14xf32>
    %11 = tpu.concatenate %9, %10 in 1 : vector<3x14xf32>, vector<3x14xf32> -> vector<3x28xf32>
    %cst_8 = arith.constant dense<0.000000e+00> : vector<16x28xf32>
    %12 = tpu.matmul %8, %11, %cst_8 {dimension_numbers = #tpu.dot_dimension_numbers<[1], [0], [0], [1], [0, 0, 1, 1], [], []>} : vector<16x3xf32>, vector<3x28xf32>, vector<16x28xf32> -> vector<16x28xf32>
    %13 = arith.addf %7, %12 : vector<16x28xf32>
    %14 = vector.extract_strided_slice %5 {offsets = [0, 3], sizes = [16, 3], strides = [1, 1]} : vector<16x9xf32> to vector<16x3xf32>
    %15 = vector.extract_strided_slice %4 {offsets = [0, 1], sizes = [3, 14], strides = [1, 1]} : vector<3x32xf32> to vector<3x14xf32>
    %16 = vector.extract_strided_slice %4 {offsets = [0, 17], sizes = [3, 14], strides = [1, 1]} : vector<3x32xf32> to vector<3x14xf32>
    %17 = tpu.concatenate %15, %16 in 1 : vector<3x14xf32>, vector<3x14xf32> -> vector<3x28xf32>
    %cst_9 = arith.constant dense<0.000000e+00> : vector<16x28xf32>
    %18 = tpu.matmul %14, %17, %cst_9 {dimension_numbers = #tpu.dot_dimension_numbers<[1], [0], [0], [1], [0, 0, 1, 1], [], []>} : vector<16x3xf32>, vector<3x28xf32>, vector<16x28xf32> -> vector<16x28xf32>
    %19 = arith.addf %13, %18 : vector<16x28xf32>
    %20 = vector.extract_strided_slice %5 {offsets = [0, 6], sizes = [16, 3], strides = [1, 1]} : vector<16x9xf32> to vector<16x3xf32>
    %21 = vector.extract_strided_slice %4 {offsets = [0, 2], sizes = [3, 14], strides = [1, 1]} : vector<3x32xf32> to vector<3x14xf32>
    %22 = vector.extract_strided_slice %4 {offsets = [0, 18], sizes = [3, 14], strides = [1, 1]} : vector<3x32xf32> to vector<3x14xf32>
    %23 = tpu.concatenate %21, %22 in 1 : vector<3x14xf32>, vector<3x14xf32> -> vector<3x28xf32>
    %cst_10 = arith.constant dense<0.000000e+00> : vector<16x28xf32>
    %24 = tpu.matmul %20, %23, %cst_10 {dimension_numbers = #tpu.dot_dimension_numbers<[1], [0], [0], [1], [0, 0, 1, 1], [], []>} : vector<16x3xf32>, vector<3x28xf32>, vector<16x28xf32> -> vector<16x28xf32>
    %25 = arith.addf %19, %24 : vector<16x28xf32>
    %26 = vector.extract_strided_slice %6 {offsets = [0, 0], sizes = [16, 1], strides = [1, 1]} : vector<16x3xf32> to vector<16x1xf32>
    %27 = vector.broadcast %26 : vector<16x1xf32> to vector<16x28xf32>
    %28 = arith.addf %25, %27 : vector<16x28xf32>
    %cst_11 = arith.constant dense<0.000000e+00> : vector<16xf32>
    %29 = vector.multi_reduction <add>, %28, %cst_11 [1] : vector<16x28xf32> to vector<16xf32>
    %30 = vector.shape_cast %29 : vector<16xf32> to vector<16x1xf32>
    %cst_12 = arith.constant 2.800000e+01 : f32
    %31 = vector.broadcast %cst_12 : f32 to vector<16x1xf32>
    %32 = arith.divf %30, %31 : vector<16x1xf32>
    %33 = vector.broadcast %32 : vector<16x1xf32> to vector<16x28xf32>
    %34 = arith.subf %28, %33 : vector<16x28xf32>
    %35 = arith.mulf %34, %34 : vector<16x28xf32>
    %cst_13 = arith.constant dense<0.000000e+00> : vector<16xf32>
    %36 = vector.multi_reduction <add>, %35, %cst_13 [1] : vector<16x28xf32> to vector<16xf32>
    %37 = vector.shape_cast %36 : vector<16xf32> to vector<16x1xf32>
    %cst_14 = arith.constant 2.800000e+01 : f32
    %38 = vector.broadcast %cst_14 : f32 to vector<16x1xf32>
    %39 = arith.divf %37, %38 : vector<16x1xf32>
    %40 = vector.broadcast %32 : vector<16x1xf32> to vector<16x28xf32>
    %41 = arith.subf %28, %40 : vector<16x28xf32>
    %cst_15 = arith.constant 9.99999974E-6 : f32
    %42 = vector.broadcast %cst_15 : f32 to vector<16x1xf32>
    %43 = arith.addf %39, %42 : vector<16x1xf32>
    %44 = math.rsqrt %43 : vector<16x1xf32>
    %45 = vector.broadcast %44 : vector<16x1xf32> to vector<16x28xf32>
    %46 = arith.mulf %41, %45 : vector<16x28xf32>
    %47 = vector.extract_strided_slice %6 {offsets = [0, 1], sizes = [16, 1], strides = [1, 1]} : vector<16x3xf32> to vector<16x1xf32>
    %48 = vector.broadcast %47 : vector<16x1xf32> to vector<16x28xf32>
    %49 = arith.mulf %46, %48 : vector<16x28xf32>
    %50 = vector.extract_strided_slice %6 {offsets = [0, 2], sizes = [16, 1], strides = [1, 1]} : vector<16x3xf32> to vector<16x1xf32>
    %51 = vector.broadcast %50 : vector<16x1xf32> to vector<16x28xf32>
    %52 = arith.addf %49, %51 : vector<16x28xf32>
    %cst_16 = arith.constant 0.000000e+00 : f32
    %53 = vector.broadcast %cst_16 : f32 to vector<16x28xf32>
    %54 = arith.cmpf oge, %52, %53 : vector<16x28xf32>
    %cst_17 = arith.constant 2.000000e-01 : f32
    %55 = vector.broadcast %cst_17 : f32 to vector<16x28xf32>
    %56 = arith.mulf %55, %52 : vector<16x28xf32>
    %57 = arith.select %54, %52, %56 : vector<16x28xi1>, vector<16x28xf32>
    %c0_18 = arith.constant 0 : index
    %c0_19 = arith.constant 0 : index
    %58 = vector.load %arg3[%c0_18, %c0_19] : memref<32x48xf32, #tpu.memory_space<vmem>>, vector<32x48xf32>
    %c0_20 = arith.constant 0 : index
    %c0_21 = arith.constant 0 : index
    %59 = vector.load %arg4[%c0_20, %c0_21] : memref<32x3xf32, #tpu.memory_space<vmem>>, vector<32x3xf32>
    %60 = vector.extract_strided_slice %57 {offsets = [0, 0], sizes = [16, 12], strides = [1, 1]} : vector<16x28xf32> to vector<16x12xf32>
    %61 = vector.extract_strided_slice %57 {offsets = [0, 14], sizes = [16, 12], strides = [1, 1]} : vector<16x28xf32> to vector<16x12xf32>
    %62 = tpu.concatenate %60, %61 in 1 : vector<16x12xf32>, vector<16x12xf32> -> vector<16x24xf32>
    %63 = vector.extract_strided_slice %57 {offsets = [0, 1], sizes = [16, 12], strides = [1, 1]} : vector<16x28xf32> to vector<16x12xf32>
    %64 = vector.extract_strided_slice %57 {offsets = [0, 15], sizes = [16, 12], strides = [1, 1]} : vector<16x28xf32> to vector<16x12xf32>
    %65 = tpu.concatenate %63, %64 in 1 : vector<16x12xf32>, vector<16x12xf32> -> vector<16x24xf32>
    %66 = vector.extract_strided_slice %57 {offsets = [0, 2], sizes = [16, 12], strides = [1, 1]} : vector<16x28xf32> to vector<16x12xf32>
    %67 = vector.extract_strided_slice %57 {offsets = [0, 16], sizes = [16, 12], strides = [1, 1]} : vector<16x28xf32> to vector<16x12xf32>
    %68 = tpu.concatenate %66, %67 in 1 : vector<16x12xf32>, vector<16x12xf32> -> vector<16x24xf32>
    %69 = tpu.concatenate %62, %65, %68 in 0 : vector<16x24xf32>, vector<16x24xf32>, vector<16x24xf32> -> vector<48x24xf32>
    %cst_22 = arith.constant dense<0.000000e+00> : vector<32x24xf32>
    %70 = tpu.matmul %58, %69, %cst_22 {dimension_numbers = #tpu.dot_dimension_numbers<[1], [0], [0], [1], [0, 0, 1, 1], [], []>} : vector<32x48xf32>, vector<48x24xf32>, vector<32x24xf32> -> vector<32x24xf32>
    %71 = vector.extract_strided_slice %59 {offsets = [0, 0], sizes = [32, 1], strides = [1, 1]} : vector<32x3xf32> to vector<32x1xf32>
    %72 = vector.broadcast %71 : vector<32x1xf32> to vector<32x24xf32>
    %73 = arith.addf %70, %72 : vector<32x24xf32>
    %cst_23 = arith.constant dense<0.000000e+00> : vector<32xf32>
    %74 = vector.multi_reduction <add>, %73, %cst_23 [1] : vector<32x24xf32> to vector<32xf32>
    %75 = vector.shape_cast %74 : vector<32xf32> to vector<32x1xf32>
    %cst_24 = arith.constant 2.400000e+01 : f32
    %76 = vector.broadcast %cst_24 : f32 to vector<32x1xf32>
    %77 = arith.divf %75, %76 : vector<32x1xf32>
    %78 = vector.broadcast %77 : vector<32x1xf32> to vector<32x24xf32>
    %79 = arith.subf %73, %78 : vector<32x24xf32>
    %80 = arith.mulf %79, %79 : vector<32x24xf32>
    %cst_25 = arith.constant dense<0.000000e+00> : vector<32xf32>
    %81 = vector.multi_reduction <add>, %80, %cst_25 [1] : vector<32x24xf32> to vector<32xf32>
    %82 = vector.shape_cast %81 : vector<32xf32> to vector<32x1xf32>
    %cst_26 = arith.constant 2.400000e+01 : f32
    %83 = vector.broadcast %cst_26 : f32 to vector<32x1xf32>
    %84 = arith.divf %82, %83 : vector<32x1xf32>
    %85 = vector.broadcast %77 : vector<32x1xf32> to vector<32x24xf32>
    %86 = arith.subf %73, %85 : vector<32x24xf32>
    %cst_27 = arith.constant 9.99999974E-6 : f32
    %87 = vector.broadcast %cst_27 : f32 to vector<32x1xf32>
    %88 = arith.addf %84, %87 : vector<32x1xf32>
    %89 = math.rsqrt %88 : vector<32x1xf32>
    %90 = vector.broadcast %89 : vector<32x1xf32> to vector<32x24xf32>
    %91 = arith.mulf %86, %90 : vector<32x24xf32>
    %92 = vector.extract_strided_slice %59 {offsets = [0, 1], sizes = [32, 1], strides = [1, 1]} : vector<32x3xf32> to vector<32x1xf32>
    %93 = vector.broadcast %92 : vector<32x1xf32> to vector<32x24xf32>
    %94 = arith.mulf %91, %93 : vector<32x24xf32>
    %95 = vector.extract_strided_slice %59 {offsets = [0, 2], sizes = [32, 1], strides = [1, 1]} : vector<32x3xf32> to vector<32x1xf32>
    %96 = vector.broadcast %95 : vector<32x1xf32> to vector<32x24xf32>
    %97 = arith.addf %94, %96 : vector<32x24xf32>
    %cst_28 = arith.constant 0.000000e+00 : f32
    %98 = vector.broadcast %cst_28 : f32 to vector<32x24xf32>
    %99 = arith.cmpf oge, %97, %98 : vector<32x24xf32>
    %cst_29 = arith.constant 2.000000e-01 : f32
    %100 = vector.broadcast %cst_29 : f32 to vector<32x24xf32>
    %101 = arith.mulf %100, %97 : vector<32x24xf32>
    %102 = arith.select %99, %97, %101 : vector<32x24xi1>, vector<32x24xf32>
    %c0_30 = arith.constant 0 : index
    %c0_31 = arith.constant 0 : index
    %103 = vector.load %arg5[%c0_30, %c0_31] : memref<64x96xf32, #tpu.memory_space<vmem>>, vector<64x96xf32>
    %c0_32 = arith.constant 0 : index
    %c0_33 = arith.constant 0 : index
    %104 = vector.load %arg6[%c0_32, %c0_33] : memref<64x3xf32, #tpu.memory_space<vmem>>, vector<64x3xf32>
    %105 = vector.extract_strided_slice %102 {offsets = [0, 0], sizes = [32, 10], strides = [1, 1]} : vector<32x24xf32> to vector<32x10xf32>
    %106 = vector.extract_strided_slice %102 {offsets = [0, 12], sizes = [32, 10], strides = [1, 1]} : vector<32x24xf32> to vector<32x10xf32>
    %107 = tpu.concatenate %105, %106 in 1 : vector<32x10xf32>, vector<32x10xf32> -> vector<32x20xf32>
    %108 = vector.extract_strided_slice %102 {offsets = [0, 1], sizes = [32, 10], strides = [1, 1]} : vector<32x24xf32> to vector<32x10xf32>
    %109 = vector.extract_strided_slice %102 {offsets = [0, 13], sizes = [32, 10], strides = [1, 1]} : vector<32x24xf32> to vector<32x10xf32>
    %110 = tpu.concatenate %108, %109 in 1 : vector<32x10xf32>, vector<32x10xf32> -> vector<32x20xf32>
    %111 = vector.extract_strided_slice %102 {offsets = [0, 2], sizes = [32, 10], strides = [1, 1]} : vector<32x24xf32> to vector<32x10xf32>
    %112 = vector.extract_strided_slice %102 {offsets = [0, 14], sizes = [32, 10], strides = [1, 1]} : vector<32x24xf32> to vector<32x10xf32>
    %113 = tpu.concatenate %111, %112 in 1 : vector<32x10xf32>, vector<32x10xf32> -> vector<32x20xf32>
    %114 = tpu.concatenate %107, %110, %113 in 0 : vector<32x20xf32>, vector<32x20xf32>, vector<32x20xf32> -> vector<96x20xf32>
    %cst_34 = arith.constant dense<0.000000e+00> : vector<64x20xf32>
    %115 = tpu.matmul %103, %114, %cst_34 {dimension_numbers = #tpu.dot_dimension_numbers<[1], [0], [0], [1], [0, 0, 1, 1], [], []>} : vector<64x96xf32>, vector<96x20xf32>, vector<64x20xf32> -> vector<64x20xf32>
    %116 = vector.extract_strided_slice %104 {offsets = [0, 0], sizes = [64, 1], strides = [1, 1]} : vector<64x3xf32> to vector<64x1xf32>
    %117 = vector.broadcast %116 : vector<64x1xf32> to vector<64x20xf32>
    %118 = arith.addf %115, %117 : vector<64x20xf32>
    %cst_35 = arith.constant dense<0.000000e+00> : vector<64xf32>
    %119 = vector.multi_reduction <add>, %118, %cst_35 [1] : vector<64x20xf32> to vector<64xf32>
    %120 = vector.shape_cast %119 : vector<64xf32> to vector<64x1xf32>
    %cst_36 = arith.constant 2.000000e+01 : f32
    %121 = vector.broadcast %cst_36 : f32 to vector<64x1xf32>
    %122 = arith.divf %120, %121 : vector<64x1xf32>
    %123 = vector.broadcast %122 : vector<64x1xf32> to vector<64x20xf32>
    %124 = arith.subf %118, %123 : vector<64x20xf32>
    %125 = arith.mulf %124, %124 : vector<64x20xf32>
    %cst_37 = arith.constant dense<0.000000e+00> : vector<64xf32>
    %126 = vector.multi_reduction <add>, %125, %cst_37 [1] : vector<64x20xf32> to vector<64xf32>
    %127 = vector.shape_cast %126 : vector<64xf32> to vector<64x1xf32>
    %cst_38 = arith.constant 2.000000e+01 : f32
    %128 = vector.broadcast %cst_38 : f32 to vector<64x1xf32>
    %129 = arith.divf %127, %128 : vector<64x1xf32>
    %130 = vector.broadcast %122 : vector<64x1xf32> to vector<64x20xf32>
    %131 = arith.subf %118, %130 : vector<64x20xf32>
    %cst_39 = arith.constant 9.99999974E-6 : f32
    %132 = vector.broadcast %cst_39 : f32 to vector<64x1xf32>
    %133 = arith.addf %129, %132 : vector<64x1xf32>
    %134 = math.rsqrt %133 : vector<64x1xf32>
    %135 = vector.broadcast %134 : vector<64x1xf32> to vector<64x20xf32>
    %136 = arith.mulf %131, %135 : vector<64x20xf32>
    %137 = vector.extract_strided_slice %104 {offsets = [0, 1], sizes = [64, 1], strides = [1, 1]} : vector<64x3xf32> to vector<64x1xf32>
    %138 = vector.broadcast %137 : vector<64x1xf32> to vector<64x20xf32>
    %139 = arith.mulf %136, %138 : vector<64x20xf32>
    %140 = vector.extract_strided_slice %104 {offsets = [0, 2], sizes = [64, 1], strides = [1, 1]} : vector<64x3xf32> to vector<64x1xf32>
    %141 = vector.broadcast %140 : vector<64x1xf32> to vector<64x20xf32>
    %142 = arith.addf %139, %141 : vector<64x20xf32>
    %cst_40 = arith.constant 0.000000e+00 : f32
    %143 = vector.broadcast %cst_40 : f32 to vector<64x20xf32>
    %144 = arith.cmpf oge, %142, %143 : vector<64x20xf32>
    %cst_41 = arith.constant 2.000000e-01 : f32
    %145 = vector.broadcast %cst_41 : f32 to vector<64x20xf32>
    %146 = arith.mulf %145, %142 : vector<64x20xf32>
    %147 = arith.select %144, %142, %146 : vector<64x20xi1>, vector<64x20xf32>
    %cst_42 = arith.constant 0.000000e+00 : f32
    %148 = vector.broadcast %cst_42 : f32 to vector<64x2xf32>
    %149 = vector.extract_strided_slice %147 {offsets = [0, 0], sizes = [64, 10], strides = [1, 1]} : vector<64x20xf32> to vector<64x10xf32>
    %150 = vector.extract_strided_slice %147 {offsets = [0, 10], sizes = [64, 10], strides = [1, 1]} : vector<64x20xf32> to vector<64x10xf32>
    %151 = tpu.concatenate %148, %149, %148, %148, %150, %148 in 1 : vector<64x2xf32>, vector<64x10xf32>, vector<64x2xf32>, vector<64x2xf32>, vector<64x10xf32>, vector<64x2xf32> -> vector<64x28xf32>
    %c0_43 = arith.constant 0 : index
    %c0_44 = arith.constant 0 : index
    %152 = vector.load %arg7[%c0_43, %c0_44] : memref<32x192xf32, #tpu.memory_space<vmem>>, vector<32x192xf32>
    %c0_45 = arith.constant 0 : index
    %c0_46 = arith.constant 0 : index
    %153 = vector.load %arg8[%c0_45, %c0_46] : memref<32x3xf32, #tpu.memory_space<vmem>>, vector<32x3xf32>
    %154 = vector.extract_strided_slice %151 {offsets = [0, 0], sizes = [64, 12], strides = [1, 1]} : vector<64x28xf32> to vector<64x12xf32>
    %155 = vector.extract_strided_slice %151 {offsets = [0, 14], sizes = [64, 12], strides = [1, 1]} : vector<64x28xf32> to vector<64x12xf32>
    %156 = tpu.concatenate %154, %155 in 1 : vector<64x12xf32>, vector<64x12xf32> -> vector<64x24xf32>
    %157 = vector.extract_strided_slice %151 {offsets = [0, 1], sizes = [64, 12], strides = [1, 1]} : vector<64x28xf32> to vector<64x12xf32>
    %158 = vector.extract_strided_slice %151 {offsets = [0, 15], sizes = [64, 12], strides = [1, 1]} : vector<64x28xf32> to vector<64x12xf32>
    %159 = tpu.concatenate %157, %158 in 1 : vector<64x12xf32>, vector<64x12xf32> -> vector<64x24xf32>
    %160 = vector.extract_strided_slice %151 {offsets = [0, 2], sizes = [64, 12], strides = [1, 1]} : vector<64x28xf32> to vector<64x12xf32>
    %161 = vector.extract_strided_slice %151 {offsets = [0, 16], sizes = [64, 12], strides = [1, 1]} : vector<64x28xf32> to vector<64x12xf32>
    %162 = tpu.concatenate %160, %161 in 1 : vector<64x12xf32>, vector<64x12xf32> -> vector<64x24xf32>
    %163 = tpu.concatenate %156, %159, %162 in 0 : vector<64x24xf32>, vector<64x24xf32>, vector<64x24xf32> -> vector<192x24xf32>
    %cst_47 = arith.constant dense<0.000000e+00> : vector<32x24xf32>
    %164 = tpu.matmul %152, %163, %cst_47 {dimension_numbers = #tpu.dot_dimension_numbers<[1], [0], [0], [1], [0, 0, 1, 1], [], []>} : vector<32x192xf32>, vector<192x24xf32>, vector<32x24xf32> -> vector<32x24xf32>
    %165 = vector.extract_strided_slice %153 {offsets = [0, 0], sizes = [32, 1], strides = [1, 1]} : vector<32x3xf32> to vector<32x1xf32>
    %166 = vector.broadcast %165 : vector<32x1xf32> to vector<32x24xf32>
    %167 = arith.addf %164, %166 : vector<32x24xf32>
    %cst_48 = arith.constant dense<0.000000e+00> : vector<32xf32>
    %168 = vector.multi_reduction <add>, %167, %cst_48 [1] : vector<32x24xf32> to vector<32xf32>
    %169 = vector.shape_cast %168 : vector<32xf32> to vector<32x1xf32>
    %cst_49 = arith.constant 2.400000e+01 : f32
    %170 = vector.broadcast %cst_49 : f32 to vector<32x1xf32>
    %171 = arith.divf %169, %170 : vector<32x1xf32>
    %172 = vector.broadcast %171 : vector<32x1xf32> to vector<32x24xf32>
    %173 = arith.subf %167, %172 : vector<32x24xf32>
    %174 = arith.mulf %173, %173 : vector<32x24xf32>
    %cst_50 = arith.constant dense<0.000000e+00> : vector<32xf32>
    %175 = vector.multi_reduction <add>, %174, %cst_50 [1] : vector<32x24xf32> to vector<32xf32>
    %176 = vector.shape_cast %175 : vector<32xf32> to vector<32x1xf32>
    %cst_51 = arith.constant 2.400000e+01 : f32
    %177 = vector.broadcast %cst_51 : f32 to vector<32x1xf32>
    %178 = arith.divf %176, %177 : vector<32x1xf32>
    %179 = vector.broadcast %171 : vector<32x1xf32> to vector<32x24xf32>
    %180 = arith.subf %167, %179 : vector<32x24xf32>
    %cst_52 = arith.constant 9.99999974E-6 : f32
    %181 = vector.broadcast %cst_52 : f32 to vector<32x1xf32>
    %182 = arith.addf %178, %181 : vector<32x1xf32>
    %183 = math.rsqrt %182 : vector<32x1xf32>
    %184 = vector.broadcast %183 : vector<32x1xf32> to vector<32x24xf32>
    %185 = arith.mulf %180, %184 : vector<32x24xf32>
    %186 = vector.extract_strided_slice %153 {offsets = [0, 1], sizes = [32, 1], strides = [1, 1]} : vector<32x3xf32> to vector<32x1xf32>
    %187 = vector.broadcast %186 : vector<32x1xf32> to vector<32x24xf32>
    %188 = arith.mulf %185, %187 : vector<32x24xf32>
    %189 = vector.extract_strided_slice %153 {offsets = [0, 2], sizes = [32, 1], strides = [1, 1]} : vector<32x3xf32> to vector<32x1xf32>
    %190 = vector.broadcast %189 : vector<32x1xf32> to vector<32x24xf32>
    %191 = arith.addf %188, %190 : vector<32x24xf32>
    %cst_53 = arith.constant 0.000000e+00 : f32
    %192 = vector.broadcast %cst_53 : f32 to vector<32x24xf32>
    %193 = arith.cmpf oge, %191, %192 : vector<32x24xf32>
    %cst_54 = arith.constant 2.000000e-01 : f32
    %194 = vector.broadcast %cst_54 : f32 to vector<32x24xf32>
    %195 = arith.mulf %194, %191 : vector<32x24xf32>
    %196 = arith.select %193, %191, %195 : vector<32x24xi1>, vector<32x24xf32>
    %cst_55 = arith.constant 0.000000e+00 : f32
    %197 = vector.broadcast %cst_55 : f32 to vector<32x2xf32>
    %198 = vector.extract_strided_slice %196 {offsets = [0, 0], sizes = [32, 12], strides = [1, 1]} : vector<32x24xf32> to vector<32x12xf32>
    %199 = vector.extract_strided_slice %196 {offsets = [0, 12], sizes = [32, 12], strides = [1, 1]} : vector<32x24xf32> to vector<32x12xf32>
    %200 = tpu.concatenate %197, %198, %197, %197, %199, %197 in 1 : vector<32x2xf32>, vector<32x12xf32>, vector<32x2xf32>, vector<32x2xf32>, vector<32x12xf32>, vector<32x2xf32> -> vector<32x32xf32>
    %c0_56 = arith.constant 0 : index
    %c0_57 = arith.constant 0 : index
    %201 = vector.load %arg9[%c0_56, %c0_57] : memref<16x96xf32, #tpu.memory_space<vmem>>, vector<16x96xf32>
    %c0_58 = arith.constant 0 : index
    %c0_59 = arith.constant 0 : index
    %202 = vector.load %arg10[%c0_58, %c0_59] : memref<16x3xf32, #tpu.memory_space<vmem>>, vector<16x3xf32>
    %203 = vector.extract_strided_slice %200 {offsets = [0, 0], sizes = [32, 14], strides = [1, 1]} : vector<32x32xf32> to vector<32x14xf32>
    %204 = vector.extract_strided_slice %200 {offsets = [0, 16], sizes = [32, 14], strides = [1, 1]} : vector<32x32xf32> to vector<32x14xf32>
    %205 = tpu.concatenate %203, %204 in 1 : vector<32x14xf32>, vector<32x14xf32> -> vector<32x28xf32>
    %206 = vector.extract_strided_slice %200 {offsets = [0, 1], sizes = [32, 14], strides = [1, 1]} : vector<32x32xf32> to vector<32x14xf32>
    %207 = vector.extract_strided_slice %200 {offsets = [0, 17], sizes = [32, 14], strides = [1, 1]} : vector<32x32xf32> to vector<32x14xf32>
    %208 = tpu.concatenate %206, %207 in 1 : vector<32x14xf32>, vector<32x14xf32> -> vector<32x28xf32>
    %209 = vector.extract_strided_slice %200 {offsets = [0, 2], sizes = [32, 14], strides = [1, 1]} : vector<32x32xf32> to vector<32x14xf32>
    %210 = vector.extract_strided_slice %200 {offsets = [0, 18], sizes = [32, 14], strides = [1, 1]} : vector<32x32xf32> to vector<32x14xf32>
    %211 = tpu.concatenate %209, %210 in 1 : vector<32x14xf32>, vector<32x14xf32> -> vector<32x28xf32>
    %212 = tpu.concatenate %205, %208, %211 in 0 : vector<32x28xf32>, vector<32x28xf32>, vector<32x28xf32> -> vector<96x28xf32>
    %cst_60 = arith.constant dense<0.000000e+00> : vector<16x28xf32>
    %213 = tpu.matmul %201, %212, %cst_60 {dimension_numbers = #tpu.dot_dimension_numbers<[1], [0], [0], [1], [0, 0, 1, 1], [], []>} : vector<16x96xf32>, vector<96x28xf32>, vector<16x28xf32> -> vector<16x28xf32>
    %214 = vector.extract_strided_slice %202 {offsets = [0, 0], sizes = [16, 1], strides = [1, 1]} : vector<16x3xf32> to vector<16x1xf32>
    %215 = vector.broadcast %214 : vector<16x1xf32> to vector<16x28xf32>
    %216 = arith.addf %213, %215 : vector<16x28xf32>
    %cst_61 = arith.constant dense<0.000000e+00> : vector<16xf32>
    %217 = vector.multi_reduction <add>, %216, %cst_61 [1] : vector<16x28xf32> to vector<16xf32>
    %218 = vector.shape_cast %217 : vector<16xf32> to vector<16x1xf32>
    %cst_62 = arith.constant 2.800000e+01 : f32
    %219 = vector.broadcast %cst_62 : f32 to vector<16x1xf32>
    %220 = arith.divf %218, %219 : vector<16x1xf32>
    %221 = vector.broadcast %220 : vector<16x1xf32> to vector<16x28xf32>
    %222 = arith.subf %216, %221 : vector<16x28xf32>
    %223 = arith.mulf %222, %222 : vector<16x28xf32>
    %cst_63 = arith.constant dense<0.000000e+00> : vector<16xf32>
    %224 = vector.multi_reduction <add>, %223, %cst_63 [1] : vector<16x28xf32> to vector<16xf32>
    %225 = vector.shape_cast %224 : vector<16xf32> to vector<16x1xf32>
    %cst_64 = arith.constant 2.800000e+01 : f32
    %226 = vector.broadcast %cst_64 : f32 to vector<16x1xf32>
    %227 = arith.divf %225, %226 : vector<16x1xf32>
    %228 = vector.broadcast %220 : vector<16x1xf32> to vector<16x28xf32>
    %229 = arith.subf %216, %228 : vector<16x28xf32>
    %cst_65 = arith.constant 9.99999974E-6 : f32
    %230 = vector.broadcast %cst_65 : f32 to vector<16x1xf32>
    %231 = arith.addf %227, %230 : vector<16x1xf32>
    %232 = math.rsqrt %231 : vector<16x1xf32>
    %233 = vector.broadcast %232 : vector<16x1xf32> to vector<16x28xf32>
    %234 = arith.mulf %229, %233 : vector<16x28xf32>
    %235 = vector.extract_strided_slice %202 {offsets = [0, 1], sizes = [16, 1], strides = [1, 1]} : vector<16x3xf32> to vector<16x1xf32>
    %236 = vector.broadcast %235 : vector<16x1xf32> to vector<16x28xf32>
    %237 = arith.mulf %234, %236 : vector<16x28xf32>
    %238 = vector.extract_strided_slice %202 {offsets = [0, 2], sizes = [16, 1], strides = [1, 1]} : vector<16x3xf32> to vector<16x1xf32>
    %239 = vector.broadcast %238 : vector<16x1xf32> to vector<16x28xf32>
    %240 = arith.addf %237, %239 : vector<16x28xf32>
    %cst_66 = arith.constant 0.000000e+00 : f32
    %241 = vector.broadcast %cst_66 : f32 to vector<16x28xf32>
    %242 = arith.cmpf oge, %240, %241 : vector<16x28xf32>
    %cst_67 = arith.constant 2.000000e-01 : f32
    %243 = vector.broadcast %cst_67 : f32 to vector<16x28xf32>
    %244 = arith.mulf %243, %240 : vector<16x28xf32>
    %245 = arith.select %242, %240, %244 : vector<16x28xi1>, vector<16x28xf32>
    %cst_68 = arith.constant 0.000000e+00 : f32
    %246 = vector.broadcast %cst_68 : f32 to vector<16x2xf32>
    %247 = vector.extract_strided_slice %245 {offsets = [0, 0], sizes = [16, 14], strides = [1, 1]} : vector<16x28xf32> to vector<16x14xf32>
    %248 = vector.extract_strided_slice %245 {offsets = [0, 14], sizes = [16, 14], strides = [1, 1]} : vector<16x28xf32> to vector<16x14xf32>
    %249 = tpu.concatenate %246, %247, %246, %246, %248, %246 in 1 : vector<16x2xf32>, vector<16x14xf32>, vector<16x2xf32>, vector<16x2xf32>, vector<16x14xf32>, vector<16x2xf32> -> vector<16x36xf32>
    %c0_69 = arith.constant 0 : index
    %c0_70 = arith.constant 0 : index
    %250 = vector.load %arg11[%c0_69, %c0_70] : memref<3x48xf32, #tpu.memory_space<vmem>>, vector<3x48xf32>
    %c0_71 = arith.constant 0 : index
    %c0_72 = arith.constant 0 : index
    %251 = vector.load %arg12[%c0_71, %c0_72] : memref<3x3xf32, #tpu.memory_space<vmem>>, vector<3x3xf32>
    %252 = vector.extract_strided_slice %249 {offsets = [0, 0], sizes = [16, 16], strides = [1, 1]} : vector<16x36xf32> to vector<16x16xf32>
    %253 = vector.extract_strided_slice %249 {offsets = [0, 18], sizes = [16, 16], strides = [1, 1]} : vector<16x36xf32> to vector<16x16xf32>
    %254 = tpu.concatenate %252, %253 in 1 : vector<16x16xf32>, vector<16x16xf32> -> vector<16x32xf32>
    %255 = vector.extract_strided_slice %249 {offsets = [0, 1], sizes = [16, 16], strides = [1, 1]} : vector<16x36xf32> to vector<16x16xf32>
    %256 = vector.extract_strided_slice %249 {offsets = [0, 19], sizes = [16, 16], strides = [1, 1]} : vector<16x36xf32> to vector<16x16xf32>
    %257 = tpu.concatenate %255, %256 in 1 : vector<16x16xf32>, vector<16x16xf32> -> vector<16x32xf32>
    %258 = vector.extract_strided_slice %249 {offsets = [0, 2], sizes = [16, 16], strides = [1, 1]} : vector<16x36xf32> to vector<16x16xf32>
    %259 = vector.extract_strided_slice %249 {offsets = [0, 20], sizes = [16, 16], strides = [1, 1]} : vector<16x36xf32> to vector<16x16xf32>
    %260 = tpu.concatenate %258, %259 in 1 : vector<16x16xf32>, vector<16x16xf32> -> vector<16x32xf32>
    %261 = tpu.concatenate %254, %257, %260 in 0 : vector<16x32xf32>, vector<16x32xf32>, vector<16x32xf32> -> vector<48x32xf32>
    %cst_73 = arith.constant dense<0.000000e+00> : vector<3x32xf32>
    %262 = tpu.matmul %250, %261, %cst_73 {dimension_numbers = #tpu.dot_dimension_numbers<[1], [0], [0], [1], [0, 0, 1, 1], [], []>} : vector<3x48xf32>, vector<48x32xf32>, vector<3x32xf32> -> vector<3x32xf32>
    %263 = vector.extract_strided_slice %251 {offsets = [0, 0], sizes = [3, 1], strides = [1, 1]} : vector<3x3xf32> to vector<3x1xf32>
    %264 = vector.broadcast %263 : vector<3x1xf32> to vector<3x32xf32>
    %265 = arith.addf %262, %264 : vector<3x32xf32>
    %266 = vector.extract_strided_slice %265 {offsets = [0, 0], sizes = [3, 16], strides = [1, 1]} : vector<3x32xf32> to vector<3x16xf32>
    %c0_74 = arith.constant 0 : index
    %c0_75 = arith.constant 0 : index
    %c0_76 = arith.constant 0 : index
    %267 = vector.load %arg13[%c0_74, %c0_75, %c0_76] : memref<2x3x16xf32, #tpu.memory_space<vmem>>, vector<1x3x16xf32>
    %268 = vector.shape_cast %267 : vector<1x3x16xf32> to vector<3x16xf32>
    %269 = vector.shape_cast %266 : vector<3x16xf32> to vector<1x3x16xf32>
    tpu.vector_store %arg13[%c0_74, %c0_75, %c0_76], %269 {strides = array<i32>} : memref<2x3x16xf32, #tpu.memory_space<vmem>>, vector<1x3x16xf32>,
    %270 = vector.extract_strided_slice %265 {offsets = [0, 16], sizes = [3, 16], strides = [1, 1]} : vector<3x32xf32> to vector<3x16xf32>
    %c1_77 = arith.constant 1 : index
    %c0_78 = arith.constant 0 : index
    %c0_79 = arith.constant 0 : index
    %271 = vector.load %arg13[%c1_77, %c0_78, %c0_79] : memref<2x3x16xf32, #tpu.memory_space<vmem>>, vector<1x3x16xf32>
    %272 = vector.shape_cast %271 : vector<1x3x16xf32> to vector<3x16xf32>
    %273 = vector.shape_cast %270 : vector<3x16xf32> to vector<1x3x16xf32>
    tpu.vector_store %arg13[%c1_77, %c0_78, %c0_79], %273 {strides = array<i32>} : memref<2x3x16xf32, #tpu.memory_space<vmem>>, vector<1x3x16xf32>,
    return
  }
}

</mosaic_0001>

<bundles_post_ra>
// kernel: tpu_custom_call.1
= control target key start
LH: loop header
LB: loop body
LE: loop exit
PB: predicated region body
PF: predicated region fallthrough
CT: control target
= control target key end

     0   :  { %s2669_s27 = smov 16   ;;  %vm51_vm0 = vcmask 130048   ;;  %s2670_s30 = smov 125   ;;  %v2674_v6 = vmov 0   ;;  %vm61_vm1 = vcmask 113664   ;;  %vm81_vm2 = vcmask 1042432   ;;  %s3472_s0 = inlined_call_operand.vmem [shape: f32[2,3,16], index: 0, kind: input, shape index: {}]   ;;  %s3473_s1 = inlined_call_operand.vmem [shape: f32[16,9], index: 1, kind: input, shape index: {}]   ;;  %s3474_s2 = inlined_call_operand.vmem [shape: f32[16,3], index: 2, kind: input, shape index: {}]   ;;  %s3475_s3 = inlined_call_operand.vmem [shape: f32[32,48], index: 3, kind: input, shape index: {}]   ;;  %s3476_s4 = inlined_call_operand.vmem [shape: f32[32,3], index: 4, kind: input, shape index: {}]   ;;  %s3477_s5 = inlined_call_operand.vmem [shape: f32[64,96], index: 5, kind: input, shape index: {}]   ;;  %s3478_s6 = inlined_call_operand.vmem [shape: f32[64,3], index: 6, kind: input, shape index: {}]   ;;  %s3479_s7 = inlined_call_operand.vmem [shape: f32[32,192], index: 7, kind: input, shape index: {}]   ;;  %s3480_s8 = inlined_call_operand.vmem [shape: f32[32,3], index: 8, kind: input, shape index: {}]   ;;  %s3481_s9 = inlined_call_operand.vmem [shape: f32[16,96], index: 9, kind: input, shape index: {}]   ;;  %s3482_s10 = inlined_call_operand.vmem [shape: f32[16,3], index: 10, kind: input, shape index: {}]   ;;  %s3483_s12 = inlined_call_operand.vmem [shape: f32[3,3], index: 12, kind: input, shape index: {}]   ;;  %s3484_s11 = inlined_call_operand.vmem [shape: f32[3,48], index: 11, kind: input, shape index: {}]   ;;  %s3485_s13 = inlined_call_operand.vmem [shape: f32[2,3,16], index: 13, kind: output, shape index: {}]  }
   0x1   :  { %v1996_v0 = vld [vmem:[%s3472_s0 + $0x4] sm:$0x7]  ;;  %v44_v1 = vld [vmem:[%s3472_s0] sm:$0x7]  ;;  %s2671_s14 = smov 127   ;;  %v54_v5 = vld [vmem:[%s3473_s1 + $0x8] sm:$0xff]  ;;  %2322 = vset.pattern.permute.xlu0 %v2674_v6  ;;  %2321 = vset.pattern.permute.xlu1 %v2674_v6 }
   0x2   :  { %48 = vrot.lane.b32.xlu0 %v1996_v0, %s2669_s27  ;;  %v53_v4 = vld [vmem:[%s3473_s1] sm:$0xff]  ;;  %s2672_s0 = smov 126   ;;  %s2673_s19 = smov 124   ;;  %v56_v7 = vld [vmem:[%s3474_s2 + $0x8] sm:$0xff]  ;;  %vm76_vm3 = vcmask 23552   ;;  %v2676_v20 = vmov 1  }
   0x3   :  { %s2675_s20 = smov 122   ;;  %v55_v8 = vld [vmem:[%s3474_s2] sm:$0xff]  ;;  %vm346_vm4 = vcmask 228352   ;;  %v2677_v29 = vmov 2   ;;  %vm461_vm7 = vcmask 392192   ;;  %vm416_vm8 = vcmask 97280  }
   0x4   :  { %v400_v63 = vld [vmem:[%s3475_s3] sm:$0xff]  ;;  %vm559_vm9 = vcmask 195584   ;;  %vm786_vm14 = vcmask 785408   ;;  %vm697_vm15 = vcmask 80896   ;;  %s2679_s18 = smov 2  }
   0x5   :  { %2113 = vmatprep.mubr.msk.f32.mxu1 %vm461_vm7, %v400_v63  ;;  %v2816_v0 = vld [vmem:[%s3476_s4] sm:$0xff] }
  0x74   :  { %v49_v2 = vpop.permute.xlu0 %48 }
  0x75   :  { %v52_v3 = vsel %vm51_vm0, %v44_v1, %v49_v2  ;;  %v2821_v1 = vld [vmem:[%s3476_s4 + $0x10] sm:$0xff]  ;;  %v2828_v2 = vld [vmem:[%s3476_s4 + $0x8] sm:$0xff] }
  0x76   :  { %66 = vrot.lane.b32.xlu1 %v52_v3, %s2670_s30  ;;  %63 = vrot.lane.b32.xlu0 %v52_v3, %s2671_s14 }
  0x7a   :  { %72 = vrot.lane.b32.xlu1 %v53_v4, %s2670_s30  ;;  %74 = vrot.lane.b32.xlu0 %v54_v5, %s2670_s30 }
  0x7e   :  { %58 = vrot.lane.b32.xlu1 %v52_v3, %s2672_s0  ;;  %242 = vrot.lane.b32.xlu0 %v52_v3, %s2673_s19 }
  0x82   :  { %246 = vrot.lane.b32.xlu1 %v53_v4, %s2675_s20  ;;  %248 = vrot.lane.b32.xlu0 %v54_v5, %s2675_s20 }
  0x86   :  { %341 = vperm.xlu0 %2322, %v56_v7   ;;  %336 = vperm.xlu1 %2321, %v55_v8  }
  0x8a   :  { %2323 = vset.pattern.permute.xlu1 %v2676_v20  ;;  %2324 = vset.pattern.permute.xlu0 %v2676_v20 }
  0xe8   :  { %v67_v9 = vpop.permute.xlu1 %66  ;;  %v64_v10 = vpop.permute.xlu0 %63 }
  0xe9   :  { %v69_v11 = vsel %vm61_vm1, %v64_v10, %v67_v9 }
  0xea   :  { %2086 = vmatprep.subr.msk.mxu0 %vm81_vm2, %v69_v11 }
  0xeb   :  { %2087 = vmatpush3.msk.msra.mxu0 %vm81_vm2, %v69_v11 }
  0xec   :  { %v73_v12 = vpop.permute.xlu1 %72  ;;  %v75_v13 = vpop.permute.xlu0 %74 }
  0xed   :  { %2088 = vmatprep.mubr.msk.f32.mxu0 %vm76_vm3, %v73_v12 }
  0xee   :  { %2089 = vmatmul.mubr.msk.f32.vlgmr.msra.gmra.mrb[0].mxu0 %vm76_vm3, %v75_v13 }
  0xef   :  { %2093 = vmatprep.mubr.msk.f32.mxu0 %vm76_vm3, %v53_v4 }
  0xf0   :  { %v59_v14 = vpop.permute.xlu1 %58  ;;  %v243_v15 = vpop.permute.xlu0 %242 }
  0xf1   :  { %v62_v16 = vsel %vm61_vm1, %v52_v3, %v59_v14  ;;  %v245_v17 = vsel %vm61_vm1, %v59_v14, %v243_v15  ;;  %v2835_v3 = vld [vmem:[%s3476_s4 + $0x18] sm:$0xff] }
  0xf2   :  { %2091 = vmatprep.subr.msk.mxu0 %vm81_vm2, %v62_v16 }
  0xf3   :  { %2092 = vmatpush3.msk.msra.mxu0 %vm81_vm2, %v62_v16 }
  0xf4   :  { %2096 = vmatprep.subr.msk.mxu0 %vm81_vm2, %v245_v17  ;;  %v247_v18 = vpop.permute.xlu1 %246  ;;  %v249_v19 = vpop.permute.xlu0 %248 }
  0xf6   :  { %2094 = vmatmul.mubr.msk.f32.vlgmr.msra.gmra.mrb[0].mxu0 %vm76_vm3, %v54_v5 }
  0xf7   :  { %2097 = vmatpush3.msk.msra.mxu0 %vm81_vm2, %v245_v17  ;;  %2098 = vmatprep.mubr.msk.f32.mxu0 %vm76_vm3, %v247_v18  ;;  %vm916_vm2 = vcmask 162816  }
  0xfe   :  { %2099 = vmatmul.mubr.msk.f32.vlgmr.msra.gmra.mrb[0].mxu0 %vm76_vm3, %v249_v19 }
 0x105   :  { %v342_v21 = vpop.permute.xlu0 %341  ;;  %v337_v22 = vpop.permute.xlu1 %336 }
 0x1d1   :  { %v2100_v23 = vpop.f32.mrb[0].mxu0 }
 0x1d2   :  { %v345_v24 = vadd.f32 %v2100_v23, %v342_v21  ;;  %v323_v25 = vpop.f32.mrb[1].mxu0 }
 0x1d3   :  { %v344_v26 = vadd.f32 %v337_v22, %v323_v25 }
 0x1d4   :  { %v350_v27 = vsel %vm346_vm4, %v345_v24, 0.0 }
 0x1d5   :  { %351 = vadd.xlane.f32.xlu0 %v350_v27  ;;  %v347_v28 = vsel %vm346_vm4, %v344_v26, 0.0  ;;  %v401_v27 = vld [vmem:[%s3475_s3 + $0x8] sm:$0xff] }
 0x1d6   :  { %348 = vadd.xlane.f32.xlu1 %v347_v28  ;;  %v402_v28 = vld [vmem:[%s3475_s3 + $0x10] sm:$0xff] }
 0x1e7   :  { %375 = vperm.xlu1 %2323, %v55_v8  }
 0x1eb   :  { %2325 = vset.pattern.permute.xlu1 %v2677_v29 }
 0x1ec   :  { %385 = vperm.xlu1 %2325, %v55_v8  }
 0x262   :  { %v352_v30 = vpop.xlane.xlu0 %351 }
 0x263   :  { %v355_v31 = vmul.f32 0.035714287, %v352_v30  ;;  %v349_v32 = vpop.xlane.xlu1 %348  ;;  %v403_v30 = vld [vmem:[%s3475_s3 + $0x18] sm:$0xff] }
 0x264   :  { %v354_v33 = vmul.f32 0.035714287, %v349_v32 }
 0x265   :  { %v357_v34 = vsub.f32 %v345_v24, %v355_v31 }
 0x266   :  { %v356_v35 = vsub.f32 %v344_v26, %v354_v33 }
 0x267   :  { %v359_v36 = vmul.f32 %v357_v34, %v357_v34  ;;  %v376_v40 = vpop.permute.xlu1 %375 }
 0x268   :  { %v358_v37 = vmul.f32 %v356_v35, %v356_v35 }
 0x269   :  { %v363_v38 = vsel %vm346_vm4, %v359_v36, 0.0 }
 0x26a   :  { %364 = vadd.xlane.f32.xlu0 %v363_v38  ;;  %v360_v39 = vsel %vm346_vm4, %v358_v37, 0.0 }
 0x26b   :  { %361 = vadd.xlane.f32.xlu1 %v360_v39  ;;  %v386_v41 = vpop.permute.xlu1 %385 }
 0x27c   :  { %389 = vperm.xlu1 %2325, %v56_v7  }
 0x280   :  { %379 = vperm.xlu0 %2324, %v56_v7   ;;  %2346 = vset.pattern.permute.xlu1 %v2674_v6 }
 0x284   :  { %2347 = vset.pattern.permute.xlu0 %v2674_v6 }
 0x285   :  { %453 = vperm.xlu0 %2347, %v2821_v1  }
 0x289   :  { %2348 = vset.pattern.permute.xlu0 %v2676_v20 }
 0x2f7   :  { %v365_v42 = vpop.xlane.xlu0 %364 }
 0x2f8   :  { %v367_v43 = vmul.f32 0.035714287, %v365_v42  ;;  %v362_v44 = vpop.xlane.xlu1 %361 }
 0x2f9   :  { %v366_v45 = vmul.f32 0.035714287, %v362_v44 }
 0x2fa   :  { %v369_v46 = vadd.f32 1e-05, %v367_v43 }
 0x2fb   :  { %v368_v47 = vadd.f32 1e-05, %v366_v45 }
 0x2fc   :  { %2629 = vrsqrt.f32 %v369_v46  ;;  %v390_v55 = vpop.permute.xlu1 %389 }
 0x2fd   :  { %2631 = vrsqrt.f32 %v368_v47 }
 0x2ff   :  { %v380_v49 = vpop.permute.xlu0 %379 }
 0x304   :  { %v454_v38 = vpop.permute.xlu0 %453 }
 0x306   :  { %v2630_v48 = vpop.eup %2629 }
 0x307   :  { %v2632_v50 = vpop.eup %2631  ;;  %v373_v51 = vmul.f32 %v2630_v48, %v357_v34 }
 0x308   :  { %v372_v52 = vmul.f32 %v2632_v50, %v356_v35 }
 0x309   :  { %v383_v53 = vmul.f32 %v380_v49, %v373_v51 }
 0x30a   :  { %v382_v54 = vmul.f32 %v376_v40, %v372_v52 }
 0x30b   :  { %v393_v56 = vadd.f32 %v390_v55, %v383_v53 }
 0x30c   :  { %v392_v57 = vadd.f32 %v386_v41, %v382_v54 }
 0x30d   :  { %vm395_vm5 = vcmp.ge.f32.partialorder %v393_v56, 0.0  ;;  %v397_v58 = vmul.f32 0.2, %v393_v56 }
 0x30e   :  { %vm394_vm6 = vcmp.ge.f32.partialorder %v392_v57, 0.0  ;;  %v396_v59 = vmul.f32 0.2, %v392_v57 }
 0x30f   :  { %v399_v60 = vsel %vm395_vm5, %v393_v56, %v397_v58 }
 0x310   :  { %v398_v61 = vsel %vm394_vm6, %v392_v57, %v396_v59 }
 0x311   :  { %v2326_v62 = vpack.i.bf16 %v399_v60, %v398_v61 }
 0x313   :  { %2327 = vrot.lane.b32.xlu1 %v2326_v62, %s2672_s0 }
 0x317   :  { %2332 = vrot.lane.b32.xlu1 %v2326_v62, %s2671_s14 }
 0x31b   :  { %2337 = vrot.lane.b32.xlu1 %v2326_v62, %s2670_s30 }
 0x31f   :  { %2342 = vrot.lane.b32.xlu1 %v2326_v62, %s2673_s19 }
 0x323   :  { %443 = vperm.xlu1 %2346, %v2816_v0  }
 0x327   :  { %448 = vperm.xlu1 %2346, %v2828_v2  }
 0x32b   :  { %458 = vperm.xlu1 %2346, %v2835_v3  }
 0x32f   :  { %2349 = vset.pattern.permute.xlu1 %v2676_v20 }
 0x385   :  { %v2328_v4 = vpop.permute.xlu1 %2327 }
 0x386   :  { %v2330_v5 = vunpack.i.h.bf16 %v2328_v4  ;;  %v2329_v7 = vunpack.i.l.bf16 %v2328_v4 }
 0x388   :  { %v417_v8 = vsel %vm416_vm8, %v398_v61, %v2329_v7  ;;  %v418_v9 = vsel %vm416_vm8, %v399_v60, %v2330_v5 }
 0x389   :  { %v2333_v10 = vpop.permute.xlu1 %2332  ;;  %v2197_v11 = vpack.c.bf16 %v418_v9, %v417_v8 }
 0x38a   :  { %v2335_v13 = vunpack.i.h.bf16 %v2333_v10  ;;  %v2334_v14 = vunpack.i.l.bf16 %v2333_v10 }
 0x38b   :  { %2198 = vmatprep.subr.bf16.mxu1 %v2197_v11 }
 0x38c   :  { %2200 = vmatpush3.bf16.msra.mxu1 %v2197_v11 }
 0x38d   :  { %v2338_v12 = vpop.permute.xlu1 %2337 }
 0x38e   :  { %v2340_v15 = vunpack.i.h.bf16 %v2338_v12  ;;  %v2339_v16 = vunpack.i.l.bf16 %v2338_v12 }
 0x390   :  { %v431_v17 = vsel %vm416_vm8, %v2334_v14, %v2339_v16  ;;  %v432_v18 = vsel %vm416_vm8, %v2335_v13, %v2340_v15 }
 0x391   :  { %v2343_v19 = vpop.permute.xlu1 %2342  ;;  %v2201_v21 = vpack.c.bf16 %v432_v18, %v431_v17 }
 0x392   :  { %v2345_v22 = vunpack.i.h.bf16 %v2343_v19  ;;  %v2344_v23 = vunpack.i.l.bf16 %v2343_v19 }
 0x393   :  { %2202 = vmatprep.subr.bf16.mxu1 %v2201_v21 }
 0x394   :  { %2204 = vmatpush3.bf16.msra.mxu1 %v2201_v21  ;;  %v439_v24 = vsel %vm416_vm8, %v2329_v7, %v2344_v23  ;;  %v440_v25 = vsel %vm416_vm8, %v2330_v5, %v2345_v22 }
 0x395   :  { %v2205_v26 = vpack.c.bf16 %v440_v25, %v439_v24 }
 0x397   :  { %2206 = vmatprep.subr.bf16.mxu1 %v2205_v26 }
 0x398   :  { %2208 = vmatpush3.bf16.msra.mxu1 %v2205_v26 }
 0x39b   :  { %2114 = vmatmul.mubr.msk.f32.vlgmr.msra.gmra.mrb[0].mxu1 %vm461_vm7, %v401_v27 }
 0x39c   :  { %2116 = vmatprep.mubr.msk.f32.mxu1 %vm461_vm7, %v402_v28 }
 0x39f   :  { %2117 = vmatmul.mubr.msk.f32.gmra.mrb[2].mxu1 %vm461_vm7, %v403_v30 }
 0x3a2   :  { %v444_v31 = vpop.permute.xlu1 %443 }
 0x3a6   :  { %v449_v32 = vpop.permute.xlu1 %448 }
 0x3aa   :  { %v459_v39 = vpop.permute.xlu1 %458 }
 0x46e   :  { %v2115_v33 = vpop.f32.mrb[0].mxu1 }
 0x46f   :  { %v546_v34 = vadd.f32 %v2115_v33, %v449_v32  ;;  %v540_v35 = vpop.f32.mrb[1].mxu1 }
 0x470   :  { %v541_v36 = vadd.f32 %v540_v35, %v444_v31 }
 0x471   :  { %v563_v37 = vsel %vm559_vm9, %v546_v34, 0.0 }
 0x472   :  { %564 = vadd.xlane.f32.xlu0 %v563_v37  ;;  %v2118_v40 = vpop.f32.mrb[2].mxu1  ;;  %v560_v41 = vsel %vm559_vm9, %v541_v36, 0.0 }
 0x473   :  { %v556_v42 = vadd.f32 %v2118_v40, %v459_v39  ;;  %v550_v43 = vpop.f32.mrb[3].mxu1  ;;  %561 = vadd.xlane.f32.xlu1 %v560_v41 }
 0x474   :  { %v551_v44 = vadd.f32 %v550_v43, %v454_v38 }
 0x475   :  { %v569_v45 = vsel %vm559_vm9, %v556_v42, 0.0 }
 0x476   :  { %v566_v46 = vsel %vm559_vm9, %v551_v44, 0.0 }
 0x477   :  { %570 = vadd.xlane.f32.xlu1 %v569_v45  ;;  %567 = vadd.xlane.f32.xlu0 %v566_v46 }
 0x4ff   :  { %v565_v47 = vpop.xlane.xlu0 %564 }
 0x500   :  { %v574_v48 = vmul.f32 0.041666668, %v565_v47  ;;  %v562_v49 = vpop.xlane.xlu1 %561 }
 0x501   :  { %v573_v50 = vmul.f32 0.041666668, %v562_v49 }
 0x502   :  { %v578_v51 = vsub.f32 %v546_v34, %v574_v48 }
 0x503   :  { %v577_v52 = vsub.f32 %v541_v36, %v573_v50 }
 0x504   :  { %v571_v53 = vpop.xlane.xlu1 %570  ;;  %v568_v54 = vpop.xlane.xlu0 %567  ;;  %v582_v55 = vmul.f32 %v578_v51, %v578_v51 }
 0x505   :  { %v576_v56 = vmul.f32 0.041666668, %v571_v53  ;;  %v575_v57 = vmul.f32 0.041666668, %v568_v54  ;;  %v581_v58 = vmul.f32 %v577_v52, %v577_v52  ;;  %v2898_v53 = vld [vmem:[%s3478_s6 + $0x8] sm:$0xff]  ;;  %v2903_v54 = vld [vmem:[%s3478_s6] sm:$0xff] }
 0x506   :  { %v588_v59 = vsel %vm559_vm9, %v582_v55, 0.0  ;;  %v2910_v55 = vld [vmem:[%s3478_s6 + $0x10] sm:$0xff] }
 0x507   :  { %v2862_v60 = vsub.f32 %v556_v42, %v576_v56  ;;  %v579_v61 = vsub.f32 %v551_v44, %v575_v57  ;;  %589 = vadd.xlane.f32.xlu1 %v588_v59  ;;  %v585_v62 = vsel %vm559_vm9, %v581_v58, 0.0  ;;  %v2915_v56 = vld [vmem:[%s3478_s6 + $0x18] sm:$0xff]  ;;  %v2922_v57 = vld [vmem:[%s3478_s6 + $0x20] sm:$0xff]  ;;  %v2927_v58 = vld [vmem:[%s3478_s6 + $0x28] sm:$0xff] }
 0x508   :  { %586 = vadd.xlane.f32.xlu0 %v585_v62  ;;  %v2934_v59 = vld [vmem:[%s3478_s6 + $0x30] sm:$0xff] }
 0x509   :  { %v584_v63 = vmul.f32 %v2862_v60, %v2862_v60  ;;  %v583_v4 = vmul.f32 %v579_v61, %v579_v61 }
 0x50b   :  { %v594_v5 = vsel %vm559_vm9, %v584_v63, 0.0  ;;  %v591_v7 = vsel %vm559_vm9, %v583_v4, 0.0 }
 0x50c   :  { %595 = vadd.xlane.f32.xlu1 %v594_v5  ;;  %592 = vadd.xlane.f32.xlu0 %v591_v7 }
 0x51d   :  { %618 = vperm.xlu1 %2349, %v2828_v2  }
 0x521   :  { %2350 = vset.pattern.permute.xlu1 %v2677_v29 }
 0x522   :  { %634 = vperm.xlu1 %2350, %v2816_v0   ;;  %614 = vperm.xlu0 %2348, %v2816_v0  }
 0x526   :  { %638 = vperm.xlu1 %2350, %v2828_v2   ;;  %2393 = vset.pattern.permute.xlu0 %v2674_v6 }
 0x52a   :  { %2351 = vset.pattern.permute.xlu1 %v2676_v20 }
 0x52b   :  { %622 = vperm.xlu1 %2351, %v2821_v1  }
 0x52f   :  { %626 = vperm.xlu1 %2351, %v2835_v3  }
 0x533   :  { %2352 = vset.pattern.permute.xlu1 %v2677_v29 }
 0x534   :  { %642 = vperm.xlu1 %2352, %v2821_v1  }
 0x538   :  { %646 = vperm.xlu1 %2352, %v2835_v3  }
 0x53c   :  { %2394 = vset.pattern.permute.xlu1 %v2674_v6 }
 0x594   :  { %v590_v8 = vpop.xlane.xlu1 %589 }
 0x595   :  { %v598_v0 = vmul.f32 0.041666668, %v590_v8  ;;  %v587_v9 = vpop.xlane.xlu0 %586 }
 0x596   :  { %v597_v2 = vmul.f32 0.041666668, %v587_v9 }
 0x597   :  { %v602_v10 = vadd.f32 1e-05, %v598_v0 }
 0x598   :  { %v601_v11 = vadd.f32 1e-05, %v597_v2 }
 0x599   :  { %2633 = vrsqrt.f32 %v602_v10  ;;  %v596_v12 = vpop.xlane.xlu1 %595  ;;  %v593_v13 = vpop.xlane.xlu0 %592 }
 0x59a   :  { %2635 = vrsqrt.f32 %v601_v11  ;;  %v599_v14 = vmul.f32 0.041666668, %v593_v13  ;;  %v600_v17 = vmul.f32 0.041666668, %v596_v12 }
 0x59c   :  { %v603_v15 = vadd.f32 1e-05, %v599_v14  ;;  %v604_v3 = vadd.f32 1e-05, %v600_v17 }
 0x59d   :  { %v619_v16 = vpop.permute.xlu1 %618 }
 0x59e   :  { %2637 = vrsqrt.f32 %v603_v15 }
 0x59f   :  { %2639 = vrsqrt.f32 %v604_v3 }
 0x5a1   :  { %v635_v1 = vpop.permute.xlu1 %634  ;;  %v615_v22 = vpop.permute.xlu0 %614 }
 0x5a3   :  { %v2634_v18 = vpop.eup %2633 }
 0x5a4   :  { %v2636_v19 = vpop.eup %2635  ;;  %v610_v21 = vmul.f32 %v2634_v18, %v578_v51 }
 0x5a5   :  { %v639_v23 = vpop.permute.xlu1 %638  ;;  %v609_v24 = vmul.f32 %v2636_v19, %v577_v52  ;;  %v665_v52 = vld [vmem:[%s3477_s5] sm:$0xff] }
 0x5a6   :  { %v630_v25 = vmul.f32 %v619_v16, %v610_v21  ;;  %2143 = vmatprep.mubr.msk.f32.mxu0 %vm786_vm14, %v665_v52 }
 0x5a7   :  { %v629_v26 = vmul.f32 %v615_v22, %v609_v24 }
 0x5a8   :  { %v650_v27 = vadd.f32 %v639_v23, %v630_v25  ;;  %v2638_v32 = vpop.eup %2637 }
 0x5a9   :  { %v649_v28 = vadd.f32 %v635_v1, %v629_v26  ;;  %v611_v36 = vmul.f32 %v2638_v32, %v579_v61  ;;  %v2640_v39 = vpop.eup %2639 }
 0x5aa   :  { %vm654_vm10 = vcmp.ge.f32.partialorder %v650_v27, 0.0  ;;  %v658_v30 = vmul.f32 0.2, %v650_v27  ;;  %v623_v31 = vpop.permute.xlu1 %622  ;;  %v612_v42 = vmul.f32 %v2640_v39, %v2862_v60  ;;  %v2939_v60 = vld [vmem:[%s3478_s6 + $0x38] sm:$0xff] }
 0x5ab   :  { %vm653_vm11 = vcmp.ge.f32.partialorder %v649_v28, 0.0  ;;  %v657_v33 = vmul.f32 0.2, %v649_v28  ;;  %v631_v40 = vmul.f32 %v623_v31, %v611_v36 }
 0x5ac   :  { %v662_v34 = vsel %vm654_vm10, %v650_v27, %v658_v30 }
 0x5ad   :  { %v661_v35 = vsel %vm653_vm11, %v649_v28, %v657_v33 }
 0x5ae   :  { %v627_v37 = vpop.permute.xlu1 %626  ;;  %v2353_v38 = vpack.i.bf16 %v662_v34, %v661_v35 }
 0x5af   :  { %v632_v44 = vmul.f32 %v627_v37, %v612_v42  ;;  %v666_v42 = vld [vmem:[%s3477_s5 + $0x8] sm:$0xff] }
 0x5b0   :  { %2354 = vrot.lane.b32.xlu0 %v2353_v38, %s2672_s0 }
 0x5b3   :  { %v643_v41 = vpop.permute.xlu1 %642 }
 0x5b4   :  { %v651_v43 = vadd.f32 %v643_v41, %v631_v40  ;;  %2359 = vrot.lane.b32.xlu0 %v2353_v38, %s2671_s14 }
 0x5b6   :  { %v659_v46 = vmul.f32 0.2, %v651_v43  ;;  %vm655_vm12 = vcmp.ge.f32.partialorder %v651_v43, 0.0 }
 0x5b7   :  { %v647_v45 = vpop.permute.xlu1 %646 }
 0x5b8   :  { %v652_v47 = vadd.f32 %v647_v45, %v632_v44  ;;  %v663_v49 = vsel %vm655_vm12, %v651_v43, %v659_v46  ;;  %v667_v43 = vld [vmem:[%s3477_s5 + $0x10] sm:$0xff]  ;;  %v668_v44 = vld [vmem:[%s3477_s5 + $0x18] sm:$0xff]  ;;  %v669_v45 = vld [vmem:[%s3477_s5 + $0x20] sm:$0xff] }
 0x5b9   :  { %v670_v46 = vld [vmem:[%s3477_s5 + $0x28] sm:$0xff] }
 0x5ba   :  { %vm656_vm13 = vcmp.ge.f32.partialorder %v652_v47, 0.0  ;;  %v660_v48 = vmul.f32 0.2, %v652_v47 }
 0x5bc   :  { %v664_v50 = vsel %vm656_vm13, %v652_v47, %v660_v48  ;;  %v671_v47 = vld [vmem:[%s3477_s5 + $0x30] sm:$0xff]  ;;  %v672_v48 = vld [vmem:[%s3477_s5 + $0x38] sm:$0xff]  ;;  %s2678_s5 = smov 6  }
 0x5bd   :  { %v2363_v51 = vpack.i.bf16 %v664_v50, %v663_v49 }
 0x5bf   :  { %2364 = vrot.lane.b32.xlu1 %v2363_v51, %s2672_s0  ;;  %2374 = vrot.lane.b32.xlu0 %v2363_v51, %s2671_s14 }
 0x5c3   :  { %2369 = vrot.lane.b32.xlu1 %v2353_v38, %s2670_s30  ;;  %2384 = vrot.lane.b32.xlu0 %v2353_v38, %s2673_s19 }
 0x5c7   :  { %2379 = vrot.lane.b32.xlu1 %v2363_v51, %s2670_s30  ;;  %748 = vperm.xlu0 %2393, %v2903_v54  }
 0x5cb   :  { %2389 = vrot.lane.b32.xlu1 %v2363_v51, %s2673_s19  ;;  %763 = vperm.xlu0 %2393, %v2915_v56  }
 0x5cf   :  { %753 = vperm.xlu1 %2394, %v2898_v53   ;;  %773 = vperm.xlu0 %2393, %v2927_v58  }
 0x5d3   :  { %758 = vperm.xlu1 %2394, %v2910_v55   ;;  %783 = vperm.xlu0 %2393, %v2939_v60  }
 0x5d7   :  { %768 = vperm.xlu1 %2394, %v2922_v57   ;;  %2395 = vset.pattern.permute.xlu0 %v2676_v20 }
 0x5db   :  { %778 = vperm.xlu1 %2394, %v2934_v59  }
 0x5df   :  { %2396 = vset.pattern.permute.xlu1 %v2676_v20 }
 0x622   :  { %v2355_v61 = vpop.permute.xlu0 %2354 }
 0x623   :  { %v2357_v62 = vunpack.i.h.bf16 %v2355_v61  ;;  %v2356_v63 = vunpack.i.l.bf16 %v2355_v61 }
 0x625   :  { %v698_v4 = vsel %vm697_vm15, %v661_v35, %v2356_v63  ;;  %v699_v5 = vsel %vm697_vm15, %v662_v34, %v2357_v62 }
 0x626   :  { %v2209_v7 = vpack.c.bf16 %v699_v5, %v698_v4  ;;  %v2360_v8 = vpop.permute.xlu0 %2359 }
 0x627   :  { %v2362_v16 = vunpack.i.h.bf16 %v2360_v8  ;;  %v2361_v17 = vunpack.i.l.bf16 %v2360_v8 }
 0x628   :  { %2210 = vmatprep.subr.bf16.mxu0 %v2209_v7 }
 0x629   :  { %2212 = vmatpush3.bf16.msra.mxu0 %v2209_v7 }
 0x631   :  { %v2365_v0 = vpop.permute.xlu1 %2364  ;;  %v2375_v9 = vpop.permute.xlu0 %2374 }
 0x632   :  { %v2367_v2 = vunpack.i.h.bf16 %v2365_v0  ;;  %v2366_v10 = vunpack.i.l.bf16 %v2365_v0  ;;  %v2377_v25 = vunpack.i.h.bf16 %v2375_v9  ;;  %v2376_v26 = vunpack.i.l.bf16 %v2375_v9 }
 0x634   :  { %v700_v11 = vsel %vm697_vm15, %v663_v49, %v2366_v10  ;;  %v701_v12 = vsel %vm697_vm15, %v664_v50, %v2367_v2 }
 0x635   :  { %v2370_v13 = vpop.permute.xlu1 %2369  ;;  %v2385_v14 = vpop.permute.xlu0 %2384  ;;  %v2213_v15 = vpack.c.bf16 %v701_v12, %v700_v11 }
 0x636   :  { %v2372_v1 = vunpack.i.h.bf16 %v2370_v13  ;;  %v2371_v18 = vunpack.i.l.bf16 %v2370_v13  ;;  %v2387_v3 = vunpack.i.h.bf16 %v2385_v14  ;;  %v2386_v19 = vunpack.i.l.bf16 %v2385_v14 }
 0x637   :  { %2214 = vmatprep.subr.bf16.mxu0 %v2213_v15 }
 0x638   :  { %2216 = vmatpush3.bf16.msra.mxu0 %v2213_v15  ;;  %v726_v21 = vsel %vm697_vm15, %v2361_v17, %v2371_v18  ;;  %v727_v22 = vsel %vm697_vm15, %v2362_v16, %v2372_v1  ;;  %v742_v32 = vsel %vm697_vm15, %v2356_v63, %v2386_v19  ;;  %v743_v33 = vsel %vm697_vm15, %v2357_v62, %v2387_v3 }
 0x639   :  { %v2380_v23 = vpop.permute.xlu1 %2379  ;;  %v2217_v24 = vpack.c.bf16 %v727_v22, %v726_v21  ;;  %v2225_v38 = vpack.c.bf16 %v743_v33, %v742_v32 }
 0x63a   :  { %v2382_v27 = vunpack.i.h.bf16 %v2380_v23  ;;  %v2381_v28 = vunpack.i.l.bf16 %v2380_v23 }
 0x63b   :  { %2218 = vmatprep.subr.bf16.mxu0 %v2217_v24 }
 0x63c   :  { %2220 = vmatpush3.bf16.msra.mxu0 %v2217_v24  ;;  %v728_v30 = vsel %vm697_vm15, %v2376_v26, %v2381_v28  ;;  %v729_v31 = vsel %vm697_vm15, %v2377_v25, %v2382_v27 }
 0x63d   :  { %v2390_v34 = vpop.permute.xlu1 %2389  ;;  %v2221_v35 = vpack.c.bf16 %v729_v31, %v728_v30 }
 0x63e   :  { %v2392_v36 = vunpack.i.h.bf16 %v2390_v34  ;;  %v2391_v37 = vunpack.i.l.bf16 %v2390_v34 }
 0x63f   :  { %2222 = vmatprep.subr.bf16.mxu0 %v2221_v35 }
 0x640   :  { %2224 = vmatpush3.bf16.msra.mxu0 %v2221_v35  ;;  %v744_v39 = vsel %vm697_vm15, %v2366_v10, %v2391_v37  ;;  %v745_v40 = vsel %vm697_vm15, %v2367_v2, %v2392_v36 }
 0x641   :  { %2226 = vmatprep.subr.bf16.mxu0 %v2225_v38  ;;  %v2229_v41 = vpack.c.bf16 %v745_v40, %v744_v39 }
 0x644   :  { %2228 = vmatpush3.bf16.msra.mxu0 %v2225_v38 }
 0x645   :  { %2230 = vmatprep.subr.bf16.mxu0 %v2229_v41 }
 0x646   :  { %v749_v49 = vpop.permute.xlu0 %748 }
 0x648   :  { %2232 = vmatpush3.bf16.msra.mxu0 %v2229_v41 }
 0x64a   :  { %v764_v51 = vpop.permute.xlu0 %763 }
 0x64b   :  { %2144 = vmatmul.mubr.msk.f32.vlgmr.msra.gmra.mrb[2].mxu0 %vm786_vm14, %v666_v42 }
 0x64c   :  { %2146 = vmatprep.mubr.msk.f32.mxu0 %vm786_vm14, %v667_v43 }
 0x64e   :  { %v754_v50 = vpop.permute.xlu1 %753  ;;  %v774_v2 = vpop.permute.xlu0 %773 }
 0x64f   :  { %2147 = vmatmul.mubr.msk.f32.gmra.mrb[4].mxu0 %vm786_vm14, %v668_v44 }
 0x650   :  { %2149 = vmatprep.mubr.msk.f32.mxu0 %vm786_vm14, %v669_v45 }
 0x652   :  { %v759_v61 = vpop.permute.xlu1 %758  ;;  %v784_v18 = vpop.permute.xlu0 %783 }
 0x653   :  { %2150 = vmatmul.mubr.msk.f32.gmra.mrb[6].mxu0 %vm786_vm14, %v670_v46 }
 0x654   :  { %2152 = vmatprep.mubr.msk.f32.mxu0 %vm786_vm14, %v671_v47 }
 0x656   :  { %v769_v11 = vpop.permute.xlu1 %768 }
 0x657   :  { %2153 = vmatmul.mubr.msk.f32.gmra.mrb[8].mxu0 %vm786_vm14, %v672_v48 }
 0x65a   :  { %v779_v21 = vpop.permute.xlu1 %778 }
 0x71e   :  { %v2145_v52 = vpop.f32.mrb[2].mxu0 }
 0x71f   :  { %v883_v62 = vadd.f32 %v2145_v52, %v754_v50  ;;  %v877_v63 = vpop.f32.mrb[3].mxu0 }
 0x720   :  { %v878_v4 = vadd.f32 %v877_v63, %v749_v49 }
 0x721   :  { %v920_v5 = vsel %vm916_vm2, %v883_v62, 0.0 }
 0x722   :  { %921 = vadd.xlane.f32.xlu0 %v920_v5  ;;  %v2148_v7 = vpop.f32.mrb[4].mxu0  ;;  %v917_v8 = vsel %vm916_vm2, %v878_v4, 0.0 }
 0x723   :  { %v2987_v0 = vadd.f32 %v2148_v7, %v764_v51  ;;  %v887_v9 = vpop.f32.mrb[5].mxu0  ;;  %918 = vadd.xlane.f32.xlu1 %v917_v8 }
 0x724   :  { %v888_v10 = vadd.f32 %v887_v9, %v759_v61 }
 0x725   :  { %v926_v12 = vsel %vm916_vm2, %v2987_v0, 0.0 }
 0x726   :  { %v2151_v13 = vpop.f32.mrb[6].mxu0  ;;  %v923_v14 = vsel %vm916_vm2, %v888_v10, 0.0 }
 0x727   :  { %v2992_v15 = vadd.f32 %v2151_v13, %v774_v2  ;;  %v897_v16 = vpop.f32.mrb[7].mxu0  ;;  %924 = vadd.xlane.f32.xlu0 %v923_v14  ;;  %927 = vadd.xlane.f32.xlu1 %v926_v12 }
 0x728   :  { %v898_v17 = vadd.f32 %v897_v16, %v769_v11 }
 0x729   :  { %v932_v1 = vsel %vm916_vm2, %v2992_v15, 0.0 }
 0x72a   :  { %v2154_v3 = vpop.f32.mrb[8].mxu0  ;;  %v929_v19 = vsel %vm916_vm2, %v898_v17, 0.0 }
 0x72b   :  { %v2997_v22 = vadd.f32 %v2154_v3, %v784_v18  ;;  %v907_v23 = vpop.f32.mrb[9].mxu0  ;;  %930 = vadd.xlane.f32.xlu0 %v929_v19  ;;  %933 = vadd.xlane.f32.xlu1 %v932_v1 }
 0x72c   :  { %v2999_v24 = vadd.f32 %v907_v23, %v779_v21 }
 0x72d   :  { %v938_v25 = vsel %vm916_vm2, %v2997_v22, 0.0 }
 0x72e   :  { %v935_v26 = vsel %vm916_vm2, %v2999_v24, 0.0 }
 0x72f   :  { %936 = vadd.xlane.f32.xlu0 %v935_v26  ;;  %939 = vadd.xlane.f32.xlu1 %v938_v25 }
 0x740   :  { %1027 = vperm.xlu1 %2396, %v2898_v53  }
 0x744   :  { %2397 = vset.pattern.permute.xlu1 %v2677_v29 }
 0x745   :  { %1063 = vperm.xlu1 %2397, %v2903_v54   ;;  %1023 = vperm.xlu0 %2395, %v2903_v54  }
 0x749   :  { %1067 = vperm.xlu1 %2397, %v2898_v53   ;;  %1043 = vperm.xlu0 %2395, %v2927_v58  }
 0x74d   :  { %2398 = vset.pattern.permute.xlu1 %v2676_v20  ;;  %2402 = vset.pattern.permute.xlu0 %v2677_v29 }
 0x74e   :  { %1031 = vperm.xlu1 %2398, %v2910_v55   ;;  %1083 = vperm.xlu0 %2402, %v2927_v58  }
 0x752   :  { %1035 = vperm.xlu1 %2398, %v2915_v56  }
 0x756   :  { %2399 = vset.pattern.permute.xlu1 %v2677_v29 }
 0x757   :  { %1071 = vperm.xlu1 %2399, %v2910_v55  }
 0x75b   :  { %1075 = vperm.xlu1 %2399, %v2915_v56  }
 0x75f   :  { %2400 = vset.pattern.permute.xlu1 %v2676_v20 }
 0x760   :  { %1039 = vperm.xlu1 %2400, %v2922_v57  }
 0x764   :  { %2401 = vset.pattern.permute.xlu1 %v2677_v29 }
 0x765   :  { %1079 = vperm.xlu1 %2401, %v2922_v57  }
 0x769   :  { %2403 = vset.pattern.permute.xlu1 %v2676_v20 }
 0x76a   :  { %1047 = vperm.xlu1 %2403, %v2934_v59  }
 0x76e   :  { %1051 = vperm.xlu1 %2403, %v2939_v60  }
 0x772   :  { %2404 = vset.pattern.permute.xlu1 %v2677_v29 }
 0x7af   :  { %v922_v53 = vpop.xlane.xlu0 %921 }
 0x7b0   :  { %v943_v54 = vmul.f32 0.05, %v922_v53  ;;  %v919_v55 = vpop.xlane.xlu1 %918 }
 0x7b1   :  { %v942_v56 = vmul.f32 0.05, %v919_v55 }
 0x7b2   :  { %v3027_v58 = vsub.f32 %v883_v62, %v943_v54 }
 0x7b3   :  { %v3029_v27 = vsub.f32 %v878_v4, %v942_v56 }
 0x7b4   :  { %v925_v28 = vpop.xlane.xlu0 %924  ;;  %v928_v30 = vpop.xlane.xlu1 %927  ;;  %v959_v57 = vmul.f32 %v3027_v58, %v3027_v58 }
 0x7b5   :  { %v944_v31 = vmul.f32 0.05, %v925_v28  ;;  %v945_v32 = vmul.f32 0.05, %v928_v30  ;;  %v958_v33 = vmul.f32 %v3029_v27, %v3029_v27 }
 0x7b6   :  { %v969_v34 = vsel %vm916_vm2, %v959_v57, 0.0 }
 0x7b7   :  { %v3036_v35 = vsub.f32 %v888_v10, %v944_v31  ;;  %v3039_v36 = vsub.f32 %v2987_v0, %v945_v32  ;;  %970 = vadd.xlane.f32.xlu1 %v969_v34  ;;  %v966_v37 = vsel %vm916_vm2, %v958_v33, 0.0 }
 0x7b8   :  { %v931_v38 = vpop.xlane.xlu0 %930  ;;  %967 = vadd.xlane.f32.xlu0 %v966_v37  ;;  %v934_v39 = vpop.xlane.xlu1 %933 }
 0x7b9   :  { %v946_v40 = vmul.f32 0.05, %v931_v38  ;;  %v947_v41 = vmul.f32 0.05, %v934_v39  ;;  %v960_v42 = vmul.f32 %v3036_v35, %v3036_v35  ;;  %v961_v43 = vmul.f32 %v3039_v36, %v3039_v36 }
 0x7bb   :  { %v3046_v44 = vsub.f32 %v898_v17, %v946_v40  ;;  %v3049_v45 = vsub.f32 %v2992_v15, %v947_v41  ;;  %v972_v46 = vsel %vm916_vm2, %v960_v42, 0.0  ;;  %v975_v47 = vsel %vm916_vm2, %v961_v43, 0.0 }
 0x7bc   :  { %v937_v48 = vpop.xlane.xlu0 %936  ;;  %973 = vadd.xlane.f32.xlu0 %v972_v46  ;;  %976 = vadd.xlane.f32.xlu1 %v975_v47  ;;  %v940_v49 = vpop.xlane.xlu1 %939 }
 0x7bd   :  { %v948_v50 = vmul.f32 0.05, %v937_v48  ;;  %v949_v51 = vmul.f32 0.05, %v940_v49  ;;  %v962_v52 = vmul.f32 %v3046_v44, %v3046_v44  ;;  %v963_v61 = vmul.f32 %v3049_v45, %v3049_v45 }
 0x7bf   :  { %v3058_v62 = vsub.f32 %v2999_v24, %v948_v50  ;;  %v3061_v63 = vsub.f32 %v2997_v22, %v949_v51  ;;  %v978_v4 = vsel %vm916_vm2, %v962_v52, 0.0  ;;  %v981_v5 = vsel %vm916_vm2, %v963_v61, 0.0 }
 0x7c0   :  { %979 = vadd.xlane.f32.xlu0 %v978_v4  ;;  %982 = vadd.xlane.f32.xlu1 %v981_v5  ;;  %v1028_v2 = vpop.permute.xlu1 %1027 }
 0x7c1   :  { %v964_v7 = vmul.f32 %v3058_v62, %v3058_v62  ;;  %v965_v8 = vmul.f32 %v3061_v63, %v3061_v63 }
 0x7c3   :  { %v984_v0 = vsel %vm916_vm2, %v964_v7, 0.0  ;;  %v987_v9 = vsel %vm916_vm2, %v965_v8, 0.0 }
 0x7c4   :  { %985 = vadd.xlane.f32.xlu0 %v984_v0  ;;  %988 = vadd.xlane.f32.xlu1 %v987_v9  ;;  %v1064_v10 = vpop.permute.xlu1 %1063 }
 0x7c8   :  { %v1068_v11 = vpop.permute.xlu1 %1067 }
 0x7cd   :  { %v1032_v12 = vpop.permute.xlu1 %1031 }
 0x7d1   :  { %v1036_v13 = vpop.permute.xlu1 %1035 }
 0x7d5   :  { %1091 = vperm.xlu1 %2404, %v2939_v60   ;;  %v1024_v60 = vpop.permute.xlu0 %1023 }
 0x7d6   :  { %v3075_v14 = vpop.permute.xlu1 %1071 }
 0x7d9   :  { %2526 = vset.pattern.permute.xlu1 %v2674_v6  ;;  %v3085_v18 = vpop.permute.xlu0 %1043 }
 0x7da   :  { %1087 = vperm.xlu0 %2402, %v2934_v59   ;;  %v3077_v15 = vpop.permute.xlu1 %1075 }
 0x7dd   :  { %v3089_v3 = vpop.permute.xlu0 %1083 }
 0x7de   :  { %2525 = vset.pattern.permute.xlu0 %v2674_v6 }
 0x7df   :  { %v3079_v16 = vpop.permute.xlu1 %1039 }
 0x7e4   :  { %v3081_v17 = vpop.permute.xlu1 %1079 }
 0x7e9   :  { %v3083_v1 = vpop.permute.xlu1 %1047 }
 0x7ed   :  { %v3087_v59 = vpop.permute.xlu1 %1051 }
 0x844   :  { %v971_v19 = vpop.xlane.xlu1 %970 }
 0x845   :  { %v991_v21 = vmul.f32 0.05, %v971_v19  ;;  %v968_v22 = vpop.xlane.xlu0 %967 }
 0x846   :  { %v990_v23 = vmul.f32 0.05, %v968_v22 }
 0x847   :  { %v999_v24 = vadd.f32 1e-05, %v991_v21 }
 0x848   :  { %v998_v25 = vadd.f32 1e-05, %v990_v23 }
 0x849   :  { %2641 = vrsqrt.f32 %v999_v24  ;;  %v974_v26 = vpop.xlane.xlu0 %973  ;;  %v977_v53 = vpop.xlane.xlu1 %976 }
 0x84a   :  { %2643 = vrsqrt.f32 %v998_v25  ;;  %v992_v54 = vmul.f32 0.05, %v974_v26  ;;  %v993_v55 = vmul.f32 0.05, %v977_v53 }
 0x84c   :  { %v1000_v56 = vadd.f32 1e-05, %v992_v54  ;;  %v1001_v28 = vadd.f32 1e-05, %v993_v55 }
 0x84d   :  { %v980_v30 = vpop.xlane.xlu0 %979  ;;  %v983_v57 = vpop.xlane.xlu1 %982 }
 0x84e   :  { %2645 = vrsqrt.f32 %v1000_v56  ;;  %v994_v31 = vmul.f32 0.05, %v980_v30  ;;  %v995_v32 = vmul.f32 0.05, %v983_v57 }
 0x84f   :  { %2647 = vrsqrt.f32 %v1001_v28 }
 0x850   :  { %v1002_v33 = vadd.f32 1e-05, %v994_v31  ;;  %v1003_v34 = vadd.f32 1e-05, %v995_v32 }
 0x851   :  { %v986_v37 = vpop.xlane.xlu0 %985  ;;  %v989_v38 = vpop.xlane.xlu1 %988 }
 0x852   :  { %2649 = vrsqrt.f32 %v1002_v33  ;;  %v996_v39 = vmul.f32 0.05, %v986_v37  ;;  %v997_v40 = vmul.f32 0.05, %v989_v38 }
 0x853   :  { %v2642_v41 = vpop.eup %2641  ;;  %2651 = vrsqrt.f32 %v1003_v34 }
 0x854   :  { %v2644_v42 = vpop.eup %2643  ;;  %v1015_v43 = vmul.f32 %v2642_v41, %v3027_v58  ;;  %v1004_v46 = vadd.f32 1e-05, %v996_v39  ;;  %v1005_v47 = vadd.f32 1e-05, %v997_v40 }
 0x855   :  { %v1014_v48 = vmul.f32 %v2644_v42, %v3029_v27  ;;  %v1092_v54 = vpop.permute.xlu1 %1091 }
 0x856   :  { %v1055_v49 = vmul.f32 %v1028_v2, %v1015_v43  ;;  %2653 = vrsqrt.f32 %v1004_v46 }
 0x857   :  { %v1054_v50 = vmul.f32 %v1024_v60, %v1014_v48  ;;  %2655 = vrsqrt.f32 %v1005_v47 }
 0x858   :  { %v2646_v51 = vpop.eup %2645  ;;  %v1095_v52 = vadd.f32 %v1068_v11, %v1055_v49 }
 0x859   :  { %v2648_v61 = vpop.eup %2647  ;;  %v1016_v4 = vmul.f32 %v2646_v51, %v3036_v35  ;;  %v1094_v5 = vadd.f32 %v1064_v10, %v1054_v50  ;;  %v1088_v55 = vpop.permute.xlu0 %1087 }
 0x85a   :  { %v1017_v7 = vmul.f32 %v2648_v61, %v3039_v36  ;;  %vm1103_vm3 = vcmp.ge.f32.partialorder %v1095_v52, 0.0  ;;  %v1111_v8 = vmul.f32 0.2, %v1095_v52 }
 0x85b   :  { %v1056_v0 = vmul.f32 %v1032_v12, %v1016_v4  ;;  %vm1102_vm5 = vcmp.ge.f32.partialorder %v1094_v5, 0.0  ;;  %v1110_v58 = vmul.f32 0.2, %v1094_v5 }
 0x85c   :  { %v2650_v9 = vpop.eup %2649  ;;  %v1057_v19 = vmul.f32 %v1036_v13, %v1017_v7  ;;  %v1119_v27 = vsel %vm1103_vm3, %v1095_v52, %v1111_v8  ;;  %vm1182_vm3 = vcmask 15360   ;;  %v2680_v7 = vmov 0.0|0.0  }
 0x85d   :  { %v2652_v2 = vpop.eup %2651  ;;  %v1018_v60 = vmul.f32 %v2650_v9, %v3046_v44  ;;  %v1118_v21 = vsel %vm1102_vm5, %v1094_v5, %v1110_v58  ;;  %v1096_v11 = vadd.f32 %v3075_v14, %v1056_v0  ;;  %vm1215_vm5 = vcmask 211968   ;;  %2233 = vmatprep.subr.bf16.mxu1 %v2680_v7 }
 0x85e   :  { %v1019_v22 = vmul.f32 %v2652_v2, %v3049_v45  ;;  %v2410_v35 = vpack.i.bf16 %v1119_v27, %v1118_v21  ;;  %v1097_v10 = vadd.f32 %v3077_v15, %v1057_v19 }
 0x85f   :  { %v1058_v36 = vmul.f32 %v3079_v16, %v1018_v60  ;;  %vm1104_vm6 = vcmp.ge.f32.partialorder %v1096_v11, 0.0  ;;  %v1112_v12 = vmul.f32 0.2, %v1096_v11 }
 0x860   :  { %v2654_v23 = vpop.eup %2653  ;;  %v1059_v24 = vmul.f32 %v3085_v18, %v1019_v22  ;;  %2411 = vrot.lane.b32.xlu1 %v2410_v35, %s2678_s5  ;;  %2406 = vrot.lane.b32.xlu0 %v2410_v35, %s2679_s18  ;;  %vm1105_vm10 = vcmp.ge.f32.partialorder %v1097_v10, 0.0  ;;  %v1113_v44 = vmul.f32 0.2, %v1097_v10 }
 0x861   :  { %v2656_v13 = vpop.eup %2655  ;;  %v1020_v45 = vmul.f32 %v2654_v23, %v3058_v62  ;;  %v1120_v14 = vsel %vm1104_vm6, %v1096_v11, %v1112_v12  ;;  %v1098_v15 = vadd.f32 %v3081_v17, %v1058_v36  ;;  %vm1384_vm6 = vcmask 523264  }
 0x862   :  { %v1121_v16 = vsel %vm1105_vm10, %v1097_v10, %v1113_v44  ;;  %v1021_v25 = vmul.f32 %v2656_v13, %v3061_v63  ;;  %v1099_v26 = vadd.f32 %v3089_v3, %v1059_v24 }
 0x863   :  { %v1060_v18 = vmul.f32 %v3083_v1, %v1020_v45  ;;  %v2420_v53 = vpack.i.bf16 %v1121_v16, %v1120_v14  ;;  %vm1106_vm11 = vcmp.ge.f32.partialorder %v1098_v15, 0.0  ;;  %v1114_v28 = vmul.f32 0.2, %v1098_v15 }
 0x864   :  { %v1061_v56 = vmul.f32 %v3087_v59, %v1021_v25  ;;  %vm1107_vm12 = vcmp.ge.f32.partialorder %v1099_v26, 0.0  ;;  %v1115_v30 = vmul.f32 0.2, %v1099_v26 }
 0x865   :  { %v1100_v62 = vadd.f32 %v1088_v55, %v1060_v18  ;;  %2421 = vrot.lane.b32.xlu1 %v2420_v53, %s2678_s5  ;;  %2416 = vrot.lane.b32.xlu0 %v2420_v53, %s2679_s18  ;;  %v1122_v63 = vsel %vm1106_vm11, %v1098_v15, %v1114_v28 }
 0x866   :  { %v1101_v17 = vadd.f32 %v1092_v54, %v1061_v56  ;;  %v1123_v57 = vsel %vm1107_vm12, %v1099_v26, %v1115_v30  ;;  %vm1626_vm12 = vcmask 146432  }
 0x867   :  { %vm1108_vm13 = vcmp.ge.f32.partialorder %v1100_v62, 0.0  ;;  %v1116_v3 = vmul.f32 0.2, %v1100_v62  ;;  %v2430_v1 = vpack.i.bf16 %v1123_v57, %v1122_v63 }
 0x868   :  { %vm1109_vm15 = vcmp.ge.f32.partialorder %v1101_v17, 0.0  ;;  %v1117_v31 = vmul.f32 0.2, %v1101_v17 }
 0x869   :  { %v1124_v32 = vsel %vm1108_vm13, %v1100_v62, %v1116_v3  ;;  %2431 = vrot.lane.b32.xlu1 %v2430_v1, %s2678_s5  ;;  %2426 = vrot.lane.b32.xlu0 %v2430_v1, %s2679_s18  ;;  %vm1631_vm13 = vcmask 244736  }
 0x86a   :  { %v1125_v59 = vsel %vm1109_vm15, %v1101_v17, %v1117_v31  ;;  %vm2681_vm15 = vmmov 0  }
 0x86b   :  { %v2440_v33 = vpack.i.bf16 %v1125_v59, %v1124_v32 }
 0x86d   :  { %2441 = vrot.lane.b32.xlu1 %v2440_v33, %s2678_s5  ;;  %2436 = vrot.lane.b32.xlu0 %v2440_v33, %s2679_s18 }
 0x8d2   :  { %v2407_v34 = vpop.permute.xlu0 %2406  ;;  %v2412_v37 = vpop.permute.xlu1 %2411 }
 0x8d3   :  { %v2409_v38 = vunpack.i.h.bf16 %v2407_v34  ;;  %v2408_v39 = vunpack.i.l.bf16 %v2407_v34  ;;  %v2414_v46 = vunpack.i.h.bf16 %v2412_v37  ;;  %v2413_v47 = vunpack.i.l.bf16 %v2412_v37 }
 0x8d5   :  { %v1184_v40 = vsel %vm1182_vm3, 0.0, %v2409_v38  ;;  %v1183_v41 = vsel %vm1182_vm3, 0.0, %v2408_v39 }
 0x8d6   :  { %v1192_v42 = vsel %vm416_vm8, %v1184_v40, 0.0  ;;  %v1191_v43 = vsel %vm416_vm8, %v1183_v41, 0.0 }
 0x8d7   :  { %v1200_v48 = vsel %vm61_vm1, %v1192_v42, 0.0  ;;  %v1199_v49 = vsel %vm61_vm1, %v1191_v43, 0.0  ;;  %v2417_v50 = vpop.permute.xlu0 %2416  ;;  %v2422_v51 = vpop.permute.xlu1 %2421 }
 0x8d8   :  { %v1208_v52 = vsel %vm51_vm0, %v1200_v48, %v2414_v46  ;;  %v1207_v61 = vsel %vm51_vm0, %v1199_v49, %v2413_v47  ;;  %v2419_v4 = vunpack.i.h.bf16 %v2417_v50  ;;  %v2418_v5 = vunpack.i.l.bf16 %v2417_v50  ;;  %v1225_v46 = vld [vmem:[%s3479_s7 + $0x8] sm:$0xff]  ;;  %v3197_v47 = vld [vmem:[%s3480_s8] sm:$0xff]  ;;  %v3209_v49 = vld [vmem:[%s3480_s8 + $0x10] sm:$0xff] }
 0x8d9   :  { %v3125_v8 = vsel %vm1215_vm5, %v1208_v52, 0.0  ;;  %v3128_v0 = vsel %vm1215_vm5, %v1207_v61, 0.0  ;;  %v2424_v60 = vunpack.i.h.bf16 %v2422_v51  ;;  %v2423_v21 = vunpack.i.l.bf16 %v2422_v51  ;;  %2018 = vmatprep.mubr.msk.f32.mxu1 %vm1384_vm6, %v1225_v46  ;;  %v3202_v48 = vld [vmem:[%s3480_s8 + $0x8] sm:$0xff]  ;;  %v3214_v50 = vld [vmem:[%s3480_s8 + $0x18] sm:$0xff] }
 0x8da   :  { %v1186_v58 = vsel %vm1182_vm3, 0.0, %v2419_v4  ;;  %v1185_v9 = vsel %vm1182_vm3, 0.0, %v2418_v5  ;;  %v2445_v19 = vpack.i.bf16 %v3125_v8, %v3128_v0 }
 0x8db   :  { %v1194_v27 = vsel %vm416_vm8, %v1186_v58, 0.0  ;;  %v1193_v2 = vsel %vm416_vm8, %v1185_v9, 0.0  ;;  %v2427_v11 = vpop.permute.xlu0 %2426  ;;  %v2432_v22 = vpop.permute.xlu1 %2431 }
 0x8dc   :  { %v1202_v35 = vsel %vm61_vm1, %v1194_v27, 0.0  ;;  %v1201_v10 = vsel %vm61_vm1, %v1193_v2, 0.0  ;;  %v2429_v36 = vunpack.i.h.bf16 %v2427_v11  ;;  %v2428_v12 = vunpack.i.l.bf16 %v2427_v11  ;;  %2446 = vrot.lane.b32.xlu0 %v2445_v19, %s2672_s0 }
 0x8dd   :  { %v1210_v23 = vsel %vm51_vm0, %v1202_v35, %v2424_v60  ;;  %v1209_v24 = vsel %vm51_vm0, %v1201_v10, %v2423_v21  ;;  %v2434_v44 = vunpack.i.h.bf16 %v2432_v22  ;;  %v2433_v26 = vunpack.i.l.bf16 %v2432_v22 }
 0x8de   :  { %v3142_v13 = vsel %vm1215_vm5, %v1210_v23, 0.0  ;;  %v3145_v45 = vsel %vm1215_vm5, %v1209_v24, 0.0  ;;  %v1188_v14 = vsel %vm1182_vm3, 0.0, %v2429_v36  ;;  %v1187_v15 = vsel %vm1182_vm3, 0.0, %v2428_v12 }
 0x8df   :  { %v1196_v16 = vsel %vm416_vm8, %v1188_v14, 0.0  ;;  %v1195_v25 = vsel %vm416_vm8, %v1187_v15, 0.0  ;;  %v2437_v18 = vpop.permute.xlu0 %2436  ;;  %v2442_v53 = vpop.permute.xlu1 %2441  ;;  %v2450_v54 = vpack.i.bf16 %v3142_v13, %v3145_v45 }
 0x8e0   :  { %v1204_v55 = vsel %vm61_vm1, %v1196_v16, 0.0  ;;  %v1203_v56 = vsel %vm61_vm1, %v1195_v25, 0.0  ;;  %v2439_v28 = vunpack.i.h.bf16 %v2437_v18  ;;  %v2438_v30 = vunpack.i.l.bf16 %v2437_v18 }
 0x8e1   :  { %v1212_v62 = vsel %vm51_vm0, %v1204_v55, %v2434_v44  ;;  %v1211_v17 = vsel %vm51_vm0, %v1203_v56, %v2433_v26  ;;  %v2444_v63 = vunpack.i.h.bf16 %v2442_v53  ;;  %2451 = vrot.lane.b32.xlu1 %v2450_v54, %s2672_s0  ;;  %v2443_v33 = vunpack.i.l.bf16 %v2442_v53 }
 0x8e2   :  { %v3159_v57 = vsel %vm1215_vm5, %v1212_v62, 0.0  ;;  %v3162_v3 = vsel %vm1215_vm5, %v1211_v17, 0.0  ;;  %v1190_v1 = vsel %vm1182_vm3, 0.0, %v2439_v28  ;;  %v1189_v31 = vsel %vm1182_vm3, 0.0, %v2438_v30 }
 0x8e3   :  { %v1198_v32 = vsel %vm416_vm8, %v1190_v1, 0.0  ;;  %v1197_v59 = vsel %vm416_vm8, %v1189_v31, 0.0  ;;  %v2455_v34 = vpack.i.bf16 %v3159_v57, %v3162_v3 }
 0x8e4   :  { %v1206_v37 = vsel %vm61_vm1, %v1198_v32, 0.0  ;;  %v1205_v38 = vsel %vm61_vm1, %v1197_v59, 0.0 }
 0x8e5   :  { %v1214_v39 = vsel %vm51_vm0, %v1206_v37, %v2444_v63  ;;  %v1213_v40 = vsel %vm51_vm0, %v1205_v38, %v2443_v33  ;;  %2456 = vrot.lane.b32.xlu0 %v2455_v34, %s2672_s0 }
 0x8e6   :  { %v1223_v41 = vsel %vm1215_vm5, %v1214_v39, 0.0  ;;  %v1222_v42 = vsel %vm1215_vm5, %v1213_v40, 0.0 }
 0x8e7   :  { %v2465_v43 = vpack.i.bf16 %v1223_v41, %v1222_v42 }
 0x8e9   :  { %2466 = vrot.lane.b32.xlu1 %v2465_v43, %s2672_s0  ;;  %2461 = vrot.lane.b32.xlu0 %v2445_v19, %s2671_s14 }
 0x8ed   :  { %2471 = vrot.lane.b32.xlu1 %v2445_v19, %s2670_s30  ;;  %2476 = vrot.lane.b32.xlu0 %v2450_v54, %s2671_s14 }
 0x8f1   :  { %2481 = vrot.lane.b32.xlu1 %v2450_v54, %s2670_s30  ;;  %2486 = vrot.lane.b32.xlu0 %v2455_v34, %s2671_s14 }
 0x8f5   :  { %2491 = vrot.lane.b32.xlu1 %v2455_v34, %s2670_s30  ;;  %2496 = vrot.lane.b32.xlu0 %v2465_v43, %s2671_s14 }
 0x8f9   :  { %2501 = vrot.lane.b32.xlu1 %v2465_v43, %s2670_s30  ;;  %2506 = vrot.lane.b32.xlu0 %v2445_v19, %s2673_s19 }
 0x8fd   :  { %2511 = vrot.lane.b32.xlu1 %v2450_v54, %s2673_s19  ;;  %2516 = vrot.lane.b32.xlu0 %v2455_v34, %s2673_s19 }
 0x901   :  { %2521 = vrot.lane.b32.xlu1 %v2465_v43, %s2673_s19  ;;  %1366 = vperm.xlu0 %2525, %v3197_v47  }
 0x905   :  { %1371 = vperm.xlu1 %2526, %v3202_v48   ;;  %1381 = vperm.xlu0 %2525, %v3214_v50  }
 0x909   :  { %1376 = vperm.xlu1 %2526, %v3209_v49   ;;  %2527 = vset.pattern.permute.xlu0 %v2676_v20 }
 0x90d   :  { %2528 = vset.pattern.permute.xlu1 %v2676_v20 }
 0x94e   :  { %v3220_v51 = vpop.permute.xlu0 %2446 }
 0x94f   :  { %v2449_v52 = vunpack.i.h.bf16 %v3220_v51  ;;  %v2448_v61 = vunpack.i.l.bf16 %v3220_v51 }
 0x951   :  { %v1269_v4 = vsel %vm416_vm8, %v3125_v8, %v2449_v52  ;;  %v1268_v5 = vsel %vm416_vm8, %v3128_v0, %v2448_v61 }
 0x952   :  { %v2234_v58 = vpack.c.bf16 %v1269_v4, %v1268_v5 }
 0x953   :  { %v3232_v9 = vpop.permute.xlu1 %2451 }
 0x954   :  { %v2454_v19 = vunpack.i.h.bf16 %v3232_v9  ;;  %v2453_v27 = vunpack.i.l.bf16 %v3232_v9  ;;  %2235 = vmatpush1.bf16.msra.mxu1 %v2234_v58 }
 0x955   :  { %2236 = vmatprep.subr.bf16.mxu1 %v2680_v7 }
 0x956   :  { %v1271_v8 = vsel %vm416_vm8, %v3142_v13, %v2454_v19  ;;  %v1270_v0 = vsel %vm416_vm8, %v3145_v45, %v2453_v27 }
 0x957   :  { %v2237_v2 = vpack.c.bf16 %v1271_v8, %v1270_v0  ;;  %v3245_v60 = vpop.permute.xlu0 %2456 }
 0x958   :  { %v2459_v21 = vunpack.i.h.bf16 %v3245_v60  ;;  %v2458_v11 = vunpack.i.l.bf16 %v3245_v60 }
 0x959   :  { %2238 = vmatpush1.bf16.msra.mxu1 %v2237_v2 }
 0x95a   :  { %v1273_v22 = vsel %vm416_vm8, %v3159_v57, %v2459_v21  ;;  %v1272_v35 = vsel %vm416_vm8, %v3162_v3, %v2458_v11  ;;  %2239 = vmatprep.subr.bf16.mxu1 %v2680_v7 }
 0x95b   :  { %v2240_v10 = vpack.c.bf16 %v1273_v22, %v1272_v35  ;;  %v3258_v36 = vpop.permute.xlu1 %2466  ;;  %v2462_v12 = vpop.permute.xlu0 %2461 }
 0x95c   :  { %v2469_v23 = vunpack.i.h.bf16 %v3258_v36  ;;  %v2468_v24 = vunpack.i.l.bf16 %v3258_v36  ;;  %v2464_v16 = vunpack.i.h.bf16 %v2462_v12  ;;  %v2463_v25 = vunpack.i.l.bf16 %v2462_v12  ;;  %v1226_v36 = vld [vmem:[%s3479_s7 + $0x10] sm:$0xff] }
 0x95d   :  { %2241 = vmatpush1.bf16.msra.mxu1 %v2240_v10 }
 0x95e   :  { %v1275_v44 = vsel %vm416_vm8, %v1223_v41, %v2469_v23  ;;  %v1274_v13 = vsel %vm416_vm8, %v1222_v42, %v2468_v24  ;;  %2242 = vmatprep.subr.bf16.mxu1 %v2680_v7 }
 0x95f   :  { %v2243_v45 = vpack.c.bf16 %v1275_v44, %v1274_v13  ;;  %v2472_v14 = vpop.permute.xlu1 %2471  ;;  %v2477_v15 = vpop.permute.xlu0 %2476 }
 0x960   :  { %v2474_v26 = vunpack.i.h.bf16 %v2472_v14  ;;  %v2473_v18 = vunpack.i.l.bf16 %v2472_v14  ;;  %v2479_v30 = vunpack.i.h.bf16 %v2477_v15  ;;  %v2478_v62 = vunpack.i.l.bf16 %v2477_v15 }
 0x961   :  { %2244 = vmatpush1.bf16.msra.mxu1 %v2243_v45 }
 0x962   :  { %v1324_v53 = vsel %vm416_vm8, %v2463_v25, %v2473_v18  ;;  %v1325_v54 = vsel %vm416_vm8, %v2464_v16, %v2474_v26  ;;  %2245 = vmatprep.subr.bf16.mxu1 %v2680_v7 }
 0x963   :  { %v2246_v55 = vpack.c.bf16 %v1325_v54, %v1324_v53  ;;  %v2482_v56 = vpop.permute.xlu1 %2481  ;;  %v2487_v28 = vpop.permute.xlu0 %2486 }
 0x964   :  { %v2484_v17 = vunpack.i.h.bf16 %v2482_v56  ;;  %v2483_v63 = vunpack.i.l.bf16 %v2482_v56  ;;  %v2489_v59 = vunpack.i.h.bf16 %v2487_v28  ;;  %v2488_v33 = vunpack.i.l.bf16 %v2487_v28  ;;  %v1230_v56 = vld [vmem:[%s3479_s7 + $0x30] sm:$0xff] }
 0x965   :  { %2247 = vmatpush1.bf16.msra.mxu1 %v2246_v55  ;;  %v1231_v55 = vld [vmem:[%s3479_s7 + $0x38] sm:$0xff] }
 0x966   :  { %v1326_v57 = vsel %vm416_vm8, %v2478_v62, %v2483_v63  ;;  %v1327_v3 = vsel %vm416_vm8, %v2479_v30, %v2484_v17  ;;  %2248 = vmatprep.subr.bf16.mxu1 %v2680_v7 }
 0x967   :  { %v2249_v1 = vpack.c.bf16 %v1327_v3, %v1326_v57  ;;  %v2492_v31 = vpop.permute.xlu1 %2491  ;;  %v2497_v32 = vpop.permute.xlu0 %2496 }
 0x968   :  { %v2494_v34 = vunpack.i.h.bf16 %v2492_v31  ;;  %v2493_v37 = vunpack.i.l.bf16 %v2492_v31  ;;  %v2499_v41 = vunpack.i.h.bf16 %v2497_v32  ;;  %v2498_v42 = vunpack.i.l.bf16 %v2497_v32 }
 0x969   :  { %2250 = vmatpush1.bf16.msra.mxu1 %v2249_v1 }
 0x96a   :  { %v1328_v38 = vsel %vm416_vm8, %v2488_v33, %v2493_v37  ;;  %v1329_v39 = vsel %vm416_vm8, %v2489_v59, %v2494_v34  ;;  %2251 = vmatprep.subr.bf16.mxu1 %v2680_v7 }
 0x96b   :  { %v2252_v40 = vpack.c.bf16 %v1329_v39, %v1328_v38  ;;  %v2502_v43 = vpop.permute.xlu1 %2501  ;;  %v2507_v46 = vpop.permute.xlu0 %2506 }
 0x96c   :  { %v2504_v4 = vunpack.i.h.bf16 %v2502_v43  ;;  %v2503_v5 = vunpack.i.l.bf16 %v2502_v43  ;;  %v2509_v58 = vunpack.i.h.bf16 %v2507_v46  ;;  %v2508_v8 = vunpack.i.l.bf16 %v2507_v46 }
 0x96d   :  { %2253 = vmatpush1.bf16.msra.mxu1 %v2252_v40 }
 0x96e   :  { %v1330_v0 = vsel %vm416_vm8, %v2498_v42, %v2503_v5  ;;  %v1331_v2 = vsel %vm416_vm8, %v2499_v41, %v2504_v4  ;;  %2254 = vmatprep.subr.bf16.mxu1 %v2680_v7  ;;  %v1356_v10 = vsel %vm416_vm8, %v2448_v61, %v2508_v8  ;;  %v1357_v12 = vsel %vm416_vm8, %v2449_v52, %v2509_v58 }
 0x96f   :  { %v2255_v22 = vpack.c.bf16 %v1331_v2, %v1330_v0  ;;  %v2512_v35 = vpop.permute.xlu1 %2511  ;;  %v2517_v45 = vpop.permute.xlu0 %2516  ;;  %v2258_v14 = vpack.c.bf16 %v1357_v12, %v1356_v10 }
 0x970   :  { %v2514_v44 = vunpack.i.h.bf16 %v2512_v35  ;;  %v2513_v13 = vunpack.i.l.bf16 %v2512_v35  ;;  %v2519_v61 = vunpack.i.h.bf16 %v2517_v45  ;;  %v2518_v25 = vunpack.i.l.bf16 %v2517_v45 }
 0x971   :  { %2256 = vmatpush1.bf16.msra.mxu1 %v2255_v22 }
 0x972   :  { %2257 = vmatprep.subr.bf16.mxu1 %v2680_v7  ;;  %v1359_v15 = vsel %vm416_vm8, %v2454_v19, %v2514_v44  ;;  %v1358_v16 = vsel %vm416_vm8, %v2453_v27, %v2513_v13  ;;  %v1360_v26 = vsel %vm416_vm8, %v2458_v11, %v2518_v25  ;;  %v1361_v18 = vsel %vm416_vm8, %v2459_v21, %v2519_v61  ;;  %v1224_v21 = vld [vmem:[%s3479_s7] sm:$0xff]  ;;  %v1227_v11 = vld [vmem:[%s3479_s7 + $0x18] sm:$0xff] }
 0x973   :  { %v2522_v51 = vpop.permute.xlu1 %2521  ;;  %v2261_v52 = vpack.c.bf16 %v1359_v15, %v1358_v16  ;;  %v2264_v9 = vpack.c.bf16 %v1361_v18, %v1360_v26 }
 0x974   :  { %v2524_v19 = vunpack.i.h.bf16 %v2522_v51  ;;  %v2523_v53 = vunpack.i.l.bf16 %v2522_v51 }
 0x975   :  { %2259 = vmatpush1.bf16.msra.mxu1 %v2258_v14 }
 0x976   :  { %2260 = vmatprep.subr.bf16.mxu1 %v2680_v7  ;;  %v1363_v27 = vsel %vm416_vm8, %v2469_v23, %v2524_v19  ;;  %v1362_v54 = vsel %vm416_vm8, %v2468_v24, %v2523_v53  ;;  %v1229_v23 = vld [vmem:[%s3479_s7 + $0x28] sm:$0xff]  ;;  %v1228_v24 = vld [vmem:[%s3479_s7 + $0x20] sm:$0xff] }
 0x977   :  { %v2267_v60 = vpack.c.bf16 %v1363_v27, %v1362_v54 }
 0x979   :  { %2262 = vmatpush1.bf16.msra.mxu1 %v2261_v52 }
 0x97a   :  { %2263 = vmatprep.subr.bf16.mxu1 %v2680_v7 }
 0x97d   :  { %2265 = vmatpush1.bf16.msra.mxu1 %v2264_v9 }
 0x97e   :  { %2266 = vmatprep.subr.bf16.mxu1 %v2680_v7 }
 0x980   :  { %v1367_v28 = vpop.permute.xlu0 %1366 }
 0x981   :  { %2268 = vmatpush1.bf16.msra.mxu1 %v2267_v60 }
 0x984   :  { %1462 = vmatmul.mubr.f32.vlgmr.msra.gmra.mrb[4].mxu1 %v1224_v21  ;;  %v1372_v63 = vpop.permute.xlu1 %1371  ;;  %v1382_v38 = vpop.permute.xlu0 %1381 }
 0x985   :  { %2019 = vmatprep.mubr.msk.f32.mxu1 %vm1384_vm6, %v1227_v11 }
 0x988   :  { %1467 = vmatmul.mubr.f32.gmra.mrb[6].mxu1 %v1226_v36  ;;  %v1377_v59 = vpop.permute.xlu1 %1376 }
 0x989   :  { %2020 = vmatprep.mubr.msk.f32.mxu1 %vm1384_vm6, %v1229_v23 }
 0x98c   :  { %1472 = vmatmul.mubr.f32.gmra.mrb[8].mxu1 %v1228_v24 }
 0x98d   :  { %2021 = vmatprep.mubr.msk.f32.mxu1 %vm1384_vm6, %v1231_v55 }
 0x990   :  { %1477 = vmatmul.mubr.f32.gmra.mrb[10].mxu1 %v1230_v56 }
 0xa57   :  { %v1463_v30 = vpop.f32.mrb[4].mxu1 }
 0xa58   :  { %v1464_v62 = vadd.f32 %v1463_v30, %v1367_v28  ;;  %v1465_v17 = vpop.f32.mrb[5].mxu1 }
 0xa5a   :  { %v1482_v57 = vsel %vm559_vm9, %v1464_v62, 0.0 }
 0xa5b   :  { %v1468_v3 = vpop.f32.mrb[6].mxu1  ;;  %1483 = vadd.xlane.f32.xlu1 %v1482_v57 }
 0xa5c   :  { %v1469_v1 = vadd.f32 %v1468_v3, %v1372_v63  ;;  %v1470_v31 = vpop.f32.mrb[7].mxu1 }
 0xa5e   :  { %v1485_v32 = vsel %vm559_vm9, %v1469_v1, 0.0 }
 0xa5f   :  { %v1473_v33 = vpop.f32.mrb[8].mxu1  ;;  %1486 = vadd.xlane.f32.xlu0 %v1485_v32 }
 0xa60   :  { %v1474_v34 = vadd.f32 %v1473_v33, %v1377_v59  ;;  %v1475_v37 = vpop.f32.mrb[9].mxu1 }
 0xa62   :  { %v1488_v39 = vsel %vm559_vm9, %v1474_v34, 0.0 }
 0xa63   :  { %v1478_v40 = vpop.f32.mrb[10].mxu1  ;;  %1489 = vadd.xlane.f32.xlu0 %v1488_v39 }
 0xa64   :  { %v1479_v41 = vadd.f32 %v1478_v40, %v1382_v38  ;;  %v1480_v42 = vpop.f32.mrb[11].mxu1 }
 0xa66   :  { %v1491_v43 = vsel %vm559_vm9, %v1479_v41, 0.0 }
 0xa67   :  { %1492 = vadd.xlane.f32.xlu1 %v1491_v43 }
 0xae8   :  { %v1484_v46 = vpop.xlane.xlu1 %1483 }
 0xae9   :  { %v1494_v4 = vmul.f32 0.041666668, %v1484_v46 }
 0xaeb   :  { %v1498_v5 = vsub.f32 %v1464_v62, %v1494_v4 }
 0xaec   :  { %v1487_v58 = vpop.xlane.xlu0 %1486 }
 0xaed   :  { %v1495_v8 = vmul.f32 0.041666668, %v1487_v58  ;;  %v1502_v0 = vmul.f32 %v1498_v5, %v1498_v5 }
 0xaef   :  { %v1499_v2 = vsub.f32 %v1469_v1, %v1495_v8  ;;  %v1506_v22 = vsel %vm559_vm9, %v1502_v0, 0.0 }
 0xaf0   :  { %v1490_v35 = vpop.xlane.xlu0 %1489  ;;  %1507 = vadd.xlane.f32.xlu0 %v1506_v22 }
 0xaf1   :  { %v1496_v10 = vmul.f32 0.041666668, %v1490_v35  ;;  %v1503_v12 = vmul.f32 %v1499_v2, %v1499_v2 }
 0xaf3   :  { %v3338_v44 = vsub.f32 %v1474_v34, %v1496_v10  ;;  %v1509_v13 = vsel %vm559_vm9, %v1503_v12, 0.0 }
 0xaf4   :  { %1510 = vadd.xlane.f32.xlu1 %v1509_v13  ;;  %v1493_v15 = vpop.xlane.xlu1 %1492 }
 0xaf5   :  { %v1504_v45 = vmul.f32 %v3338_v44, %v3338_v44  ;;  %v1497_v16 = vmul.f32 0.041666668, %v1493_v15 }
 0xaf7   :  { %v1512_v14 = vsel %vm559_vm9, %v1504_v45, 0.0  ;;  %v1501_v61 = vsub.f32 %v1479_v41, %v1497_v16 }
 0xaf8   :  { %1513 = vadd.xlane.f32.xlu0 %v1512_v14 }
 0xaf9   :  { %v1505_v25 = vmul.f32 %v1501_v61, %v1501_v61 }
 0xb05   :  { %1539 = vperm.xlu1 %2528, %v3202_v48  }
 0xb09   :  { %2529 = vset.pattern.permute.xlu1 %v2677_v29 }
 0xb0a   :  { %1555 = vperm.xlu1 %2529, %v3197_v47  }
 0xb0e   :  { %1559 = vperm.xlu1 %2529, %v3202_v48   ;;  %1535 = vperm.xlu0 %2527, %v3197_v47   ;;  %v1515_v48 = vsel %vm559_vm9, %v1505_v25, 0.0 }
 0xb12   :  { %2530 = vset.pattern.permute.xlu1 %v2676_v20  ;;  %2592 = vset.pattern.permute.xlu0 %v2674_v6 }
 0xb13   :  { %1543 = vperm.xlu1 %2530, %v3209_v49  }
 0xb17   :  { %1547 = vperm.xlu1 %2530, %v3214_v50  }
 0xb1b   :  { %2531 = vset.pattern.permute.xlu1 %v2677_v29 }
 0xb1c   :  { %1563 = vperm.xlu1 %2531, %v3209_v49  }
 0xb40   :  { %1516 = vadd.xlane.f32.xlu1 %v1515_v48 }
 0xb51   :  { %1567 = vperm.xlu1 %2531, %v3214_v50  }
 0xb55   :  { %2593 = vset.pattern.permute.xlu1 %v2674_v6 }
 0xb7d   :  { %v1508_v47 = vpop.xlane.xlu0 %1507 }
 0xb7e   :  { %v1518_v51 = vmul.f32 0.041666668, %v1508_v47 }
 0xb80   :  { %v1522_v52 = vadd.f32 1e-05, %v1518_v51 }
 0xb81   :  { %v1511_v26 = vpop.xlane.xlu1 %1510 }
 0xb82   :  { %2657 = vrsqrt.f32 %v1522_v52  ;;  %v1519_v18 = vmul.f32 0.041666668, %v1511_v26 }
 0xb84   :  { %v1523_v19 = vadd.f32 1e-05, %v1519_v18 }
 0xb85   :  { %v1540_v49 = vpop.permute.xlu1 %1539  ;;  %v1514_v53 = vpop.xlane.xlu0 %1513 }
 0xb86   :  { %2659 = vrsqrt.f32 %v1523_v19  ;;  %v1520_v57 = vmul.f32 0.041666668, %v1514_v53 }
 0xb88   :  { %v1524_v1 = vadd.f32 1e-05, %v1520_v57 }
 0xb89   :  { %v1556_v60 = vpop.permute.xlu1 %1555 }
 0xb8a   :  { %2661 = vrsqrt.f32 %v1524_v1 }
 0xb8c   :  { %v2658_v9 = vpop.eup %2657 }
 0xb8d   :  { %v1530_v27 = vmul.f32 %v2658_v9, %v1498_v5  ;;  %v1536_v54 = vpop.permute.xlu0 %1535  ;;  %v1560_v24 = vpop.permute.xlu1 %1559 }
 0xb8f   :  { %v1550_v21 = vmul.f32 %v1536_v54, %v1530_v27 }
 0xb90   :  { %v2660_v11 = vpop.eup %2659 }
 0xb91   :  { %v1531_v36 = vmul.f32 %v2660_v11, %v1499_v2  ;;  %v1570_v50 = vadd.f32 %v1556_v60, %v1550_v21 }
 0xb92   :  { %v1544_v63 = vpop.permute.xlu1 %1543 }
 0xb93   :  { %v1551_v23 = vmul.f32 %v1540_v49, %v1531_v36  ;;  %v1578_v55 = vmul.f32 0.2, %v1570_v50  ;;  %vm1574_vm8 = vcmp.ge.f32.partialorder %v1570_v50, 0.0 }
 0xb94   :  { %v2662_v34 = vpop.eup %2661 }
 0xb95   :  { %v1571_v56 = vadd.f32 %v1560_v24, %v1551_v23  ;;  %v1582_v30 = vsel %vm1574_vm8, %v1570_v50, %v1578_v55  ;;  %v1532_v37 = vmul.f32 %v2662_v34, %v3338_v44 }
 0xb96   :  { %v1548_v3 = vpop.permute.xlu1 %1547 }
 0xb97   :  { %vm1575_vm9 = vcmp.ge.f32.partialorder %v1571_v56, 0.0  ;;  %v1579_v28 = vmul.f32 0.2, %v1571_v56  ;;  %v1552_v38 = vmul.f32 %v1544_v63, %v1532_v37 }
 0xb99   :  { %v1583_v62 = vsel %vm1575_vm9, %v1571_v56, %v1579_v28  ;;  %v1636_v28 = vld [vmem:[%s3481_s9] sm:$0xff] }
 0xb9a   :  { %v2537_v17 = vpack.i.bf16 %v1583_v62, %v1582_v30  ;;  %2179 = vmatprep.mubr.msk.f32.mxu0 %vm786_vm14, %v1636_v28  ;;  %v3398_v30 = vld [vmem:[%s3482_s10 + $0x8] sm:$0xff]  ;;  %v3403_v62 = vld [vmem:[%s3482_s10] sm:$0xff] }
 0xb9b   :  { %v1564_v31 = vpop.permute.xlu1 %1563 }
 0xb9c   :  { %2538 = vrot.lane.b32.xlu1 %v2537_v17, %s2678_s5  ;;  %2533 = vrot.lane.b32.xlu0 %v2537_v17, %s2679_s18  ;;  %v1572_v40 = vadd.f32 %v1564_v31, %v1552_v38 }
 0xb9e   :  { %v1580_v46 = vmul.f32 0.2, %v1572_v40  ;;  %vm1576_vm10 = vcmp.ge.f32.partialorder %v1572_v40, 0.0 }
 0xba0   :  { %v1584_v58 = vsel %vm1576_vm10, %v1572_v40, %v1580_v46 }
 0xbcd   :  { %v1517_v32 = vpop.xlane.xlu1 %1516 }
 0xbce   :  { %v1521_v59 = vmul.f32 0.041666668, %v1517_v32 }
 0xbd0   :  { %v1525_v33 = vadd.f32 1e-05, %v1521_v59 }
 0xbd1   :  { %v1568_v43 = vpop.permute.xlu1 %1567 }
 0xbd2   :  { %2663 = vrsqrt.f32 %v1525_v33 }
 0xbdc   :  { %v2664_v39 = vpop.eup %2663 }
 0xbdd   :  { %v1533_v41 = vmul.f32 %v2664_v39, %v1501_v61 }
 0xbdf   :  { %v1553_v42 = vmul.f32 %v1548_v3, %v1533_v41 }
 0xbe1   :  { %v1573_v4 = vadd.f32 %v1568_v43, %v1553_v42 }
 0xbe3   :  { %vm1577_vm11 = vcmp.ge.f32.partialorder %v1573_v4, 0.0  ;;  %v1581_v5 = vmul.f32 0.2, %v1573_v4 }
 0xbe5   :  { %v1585_v8 = vsel %vm1577_vm11, %v1573_v4, %v1581_v5 }
 0xbe6   :  { %v2547_v0 = vpack.i.bf16 %v1585_v8, %v1584_v58 }
 0xbe8   :  { %2548 = vrot.lane.b32.xlu1 %v2547_v0, %s2678_s5  ;;  %2543 = vrot.lane.b32.xlu0 %v2547_v0, %s2679_s18 }
 0xc0e   :  { %v2534_v2 = vpop.permute.xlu0 %2533  ;;  %v2539_v10 = vpop.permute.xlu1 %2538 }
 0xc0f   :  { %v2536_v22 = vunpack.i.h.bf16 %v2534_v2  ;;  %v2535_v35 = vunpack.i.l.bf16 %v2534_v2  ;;  %v2541_v14 = vunpack.i.h.bf16 %v2539_v10  ;;  %v2540_v15 = vunpack.i.l.bf16 %v2539_v10 }
 0xc11   :  { %v1615_v12 = vsel %vm1182_vm3, 0.0, %v2536_v22  ;;  %v1614_v44 = vsel %vm1182_vm3, 0.0, %v2535_v35 }
 0xc12   :  { %v1619_v13 = vsel %vm61_vm1, %v1615_v12, 0.0  ;;  %v1618_v45 = vsel %vm61_vm1, %v1614_v44, 0.0 }
 0xc13   :  { %v1623_v16 = vsel %vm51_vm0, %v1619_v13, 0.0  ;;  %v1622_v61 = vsel %vm51_vm0, %v1618_v45, 0.0 }
 0xc14   :  { %v1628_v25 = vsel %vm1626_vm12, %v1623_v16, %v2541_v14  ;;  %v1627_v48 = vsel %vm1626_vm12, %v1622_v61, %v2540_v15 }
 0xc15   :  { %v1633_v47 = vsel %vm1631_vm13, %v1628_v25, 0.0  ;;  %v1632_v51 = vsel %vm1631_vm13, %v1627_v48, 0.0 }
 0xc16   :  { %v2552_v52 = vpack.i.bf16 %v1633_v47, %v1632_v51 }
 0xc18   :  { %2553 = vrot.lane.b32.xlu0 %v2552_v52, %s2672_s0 }
 0xc1c   :  { %2558 = vrot.lane.b32.xlu0 %v2552_v52, %s2671_s14 }
 0xc5a   :  { %v2544_v26 = vpop.permute.xlu0 %2543  ;;  %v2549_v49 = vpop.permute.xlu1 %2548 }
 0xc5b   :  { %v2546_v18 = vunpack.i.h.bf16 %v2544_v26  ;;  %v2545_v19 = vunpack.i.l.bf16 %v2544_v26  ;;  %v2551_v60 = vunpack.i.h.bf16 %v2549_v49  ;;  %v2550_v21 = vunpack.i.l.bf16 %v2549_v49 }
 0xc5d   :  { %v1617_v53 = vsel %vm1182_vm3, 0.0, %v2546_v18  ;;  %v1616_v9 = vsel %vm1182_vm3, 0.0, %v2545_v19  ;;  %v1637_v18 = vld [vmem:[%s3481_s9 + $0x8] sm:$0xff] }
 0xc5e   :  { %v1621_v27 = vsel %vm61_vm1, %v1617_v53, 0.0  ;;  %v1620_v54 = vsel %vm61_vm1, %v1616_v9, 0.0 }
 0xc5f   :  { %v1625_v11 = vsel %vm51_vm0, %v1621_v27, 0.0  ;;  %v1624_v36 = vsel %vm51_vm0, %v1620_v54, 0.0 }
 0xc60   :  { %v1630_v50 = vsel %vm1626_vm12, %v1625_v11, %v2551_v60  ;;  %v1629_v23 = vsel %vm1626_vm12, %v1624_v36, %v2550_v21 }
 0xc61   :  { %v1635_v24 = vsel %vm1631_vm13, %v1630_v50, 0.0  ;;  %v1634_v55 = vsel %vm1631_vm13, %v1629_v23, 0.0 }
 0xc62   :  { %v2562_v56 = vpack.i.bf16 %v1635_v24, %v1634_v55 }
 0xc64   :  { %2563 = vrot.lane.b32.xlu1 %v2562_v56, %s2672_s0  ;;  %2573 = vrot.lane.b32.xlu0 %v2562_v56, %s2671_s14 }
 0xc68   :  { %2568 = vrot.lane.b32.xlu1 %v2552_v52, %s2670_s30  ;;  %2583 = vrot.lane.b32.xlu0 %v2552_v52, %s2673_s19 }
 0xc6c   :  { %2578 = vrot.lane.b32.xlu1 %v2562_v56, %s2670_s30  ;;  %1706 = vperm.xlu0 %2592, %v3403_v62  }
 0xc70   :  { %2588 = vrot.lane.b32.xlu1 %v2562_v56, %s2673_s19  ;;  %2594 = vset.pattern.permute.xlu0 %v2676_v20 }
 0xc74   :  { %1711 = vperm.xlu1 %2593, %v3398_v30  }
 0xc78   :  { %2595 = vset.pattern.permute.xlu1 %v2676_v20 }
 0xc8a   :  { %v2554_v17 = vpop.permute.xlu0 %2553 }
 0xc8b   :  { %v2556_v63 = vunpack.i.h.bf16 %v2554_v17  ;;  %v2555_v57 = vunpack.i.l.bf16 %v2554_v17 }
 0xc8d   :  { %v1656_v3 = vsel %vm61_vm1, %v1632_v51, %v2555_v57  ;;  %v1657_v1 = vsel %vm61_vm1, %v1633_v47, %v2556_v63 }
 0xc8e   :  { %v2269_v31 = vpack.c.bf16 %v1657_v1, %v1656_v3  ;;  %v2559_v32 = vpop.permute.xlu0 %2558 }
 0xc8f   :  { %v2561_v42 = vunpack.i.h.bf16 %v2559_v32  ;;  %v2560_v43 = vunpack.i.l.bf16 %v2559_v32 }
 0xc90   :  { %2270 = vmatprep.subr.bf16.mxu0 %v2269_v31 }
 0xc91   :  { %2272 = vmatpush3.bf16.msra.mxu0 %v2269_v31 }
 0xcd6   :  { %v2564_v59 = vpop.permute.xlu1 %2563  ;;  %v2574_v33 = vpop.permute.xlu0 %2573 }
 0xcd7   :  { %v2566_v34 = vunpack.i.h.bf16 %v2564_v59  ;;  %v2565_v37 = vunpack.i.l.bf16 %v2564_v59  ;;  %v2576_v35 = vunpack.i.h.bf16 %v2574_v33  ;;  %v2575_v10 = vunpack.i.l.bf16 %v2574_v33 }
 0xcd9   :  { %v1658_v38 = vsel %vm61_vm1, %v1634_v55, %v2565_v37  ;;  %v1659_v39 = vsel %vm61_vm1, %v1635_v24, %v2566_v34 }
 0xcda   :  { %v2569_v20 = vpop.permute.xlu1 %2568  ;;  %v2584_v40 = vpop.permute.xlu0 %2583  ;;  %v2273_v41 = vpack.c.bf16 %v1659_v39, %v1658_v38 }
 0xcdb   :  { %v2571_v46 = vunpack.i.h.bf16 %v2569_v20  ;;  %v2570_v4 = vunpack.i.l.bf16 %v2569_v20  ;;  %v2586_v5 = vunpack.i.h.bf16 %v2584_v40  ;;  %v2585_v58 = vunpack.i.l.bf16 %v2584_v40 }
 0xcdc   :  { %2274 = vmatprep.subr.bf16.mxu0 %v2273_v41 }
 0xcdd   :  { %2276 = vmatpush3.bf16.msra.mxu0 %v2273_v41  ;;  %v1684_v8 = vsel %vm61_vm1, %v2560_v43, %v2570_v4  ;;  %v1685_v0 = vsel %vm61_vm1, %v2561_v42, %v2571_v46  ;;  %v1700_v14 = vsel %vm61_vm1, %v2555_v57, %v2585_v58  ;;  %v1701_v15 = vsel %vm61_vm1, %v2556_v63, %v2586_v5 }
 0xcde   :  { %v2579_v2 = vpop.permute.xlu1 %2578  ;;  %v2277_v22 = vpack.c.bf16 %v1685_v0, %v1684_v8  ;;  %v2285_v47 = vpack.c.bf16 %v1701_v15, %v1700_v14 }
 0xcdf   :  { %v2581_v12 = vunpack.i.h.bf16 %v2579_v2  ;;  %v2580_v44 = vunpack.i.l.bf16 %v2579_v2 }
 0xce0   :  { %2278 = vmatprep.subr.bf16.mxu0 %v2277_v22 }
 0xce1   :  { %2280 = vmatpush3.bf16.msra.mxu0 %v2277_v22  ;;  %v1686_v13 = vsel %vm61_vm1, %v2575_v10, %v2580_v44  ;;  %v1687_v45 = vsel %vm61_vm1, %v2576_v35, %v2581_v12 }
 0xce2   :  { %v2589_v16 = vpop.permute.xlu1 %2588  ;;  %v2281_v61 = vpack.c.bf16 %v1687_v45, %v1686_v13 }
 0xce3   :  { %v2591_v25 = vunpack.i.h.bf16 %v2589_v16  ;;  %v2590_v48 = vunpack.i.l.bf16 %v2589_v16 }
 0xce4   :  { %2282 = vmatprep.subr.bf16.mxu0 %v2281_v61 }
 0xce5   :  { %2284 = vmatpush3.bf16.msra.mxu0 %v2281_v61  ;;  %v1702_v51 = vsel %vm61_vm1, %v2565_v37, %v2590_v48  ;;  %v1703_v52 = vsel %vm61_vm1, %v2566_v34, %v2591_v25 }
 0xce6   :  { %2286 = vmatprep.subr.bf16.mxu0 %v2285_v47  ;;  %v2289_v26 = vpack.c.bf16 %v1703_v52, %v1702_v51  ;;  %v1873_v51 = vld [vmem:[%s3483_s12] sm:$0x7] }
 0xce9   :  { %2288 = vmatpush3.bf16.msra.mxu0 %v2285_v47  ;;  %v2682_v47 = vmov 0.0  }
 0xcea   :  { %2290 = vmatprep.subr.bf16.mxu0 %v2289_v26 }
 0xceb   :  { %v1707_v49 = vpop.permute.xlu0 %1706 }
 0xced   :  { %2292 = vmatpush3.bf16.msra.mxu0 %v2289_v26 }
 0xcee   :  { %2293 = vmatprep.subr.bf16.mxu0 %v2680_v7 }
 0xcf0   :  { %2180 = vmatmul.mubr.msk.f32.vlgmr.msra.gmra.mrb[10].mxu0 %vm786_vm14, %v1637_v18  ;;  %vm1869_vm14 = vcmask 277504  }
 0xcf1   :  { %2194 = vmatprep.mubr.msk.f32.mxu0 %vm2681_vm15, %v2682_v47 }
 0xcf3   :  { %v1712_v19 = vpop.permute.xlu1 %1711 }
 0xdc3   :  { %v2181_v53 = vpop.f32.mrb[10].mxu0 }
 0xdc4   :  { %v1792_v9 = vadd.f32 %v2181_v53, %v1712_v19  ;;  %v1786_v27 = vpop.f32.mrb[11].mxu0 }
 0xdc5   :  { %v1787_v54 = vadd.f32 %v1786_v27, %v1707_v49 }
 0xdc6   :  { %v1798_v60 = vsel %vm346_vm4, %v1792_v9, 0.0 }
 0xdc7   :  { %1799 = vadd.xlane.f32.xlu0 %v1798_v60  ;;  %v1795_v21 = vsel %vm346_vm4, %v1787_v54, 0.0 }
 0xdc8   :  { %1796 = vadd.xlane.f32.xlu1 %v1795_v21 }
 0xe54   :  { %v1800_v11 = vpop.xlane.xlu0 %1799 }
 0xe55   :  { %v1802_v36 = vmul.f32 0.035714287, %v1800_v11  ;;  %v1797_v50 = vpop.xlane.xlu1 %1796 }
 0xe56   :  { %v1801_v23 = vmul.f32 0.035714287, %v1797_v50 }
 0xe57   :  { %v1804_v24 = vsub.f32 %v1792_v9, %v1802_v36 }
 0xe58   :  { %v1803_v55 = vsub.f32 %v1787_v54, %v1801_v23 }
 0xe59   :  { %v1806_v56 = vmul.f32 %v1804_v24, %v1804_v24 }
 0xe5a   :  { %v1805_v28 = vmul.f32 %v1803_v55, %v1803_v55 }
 0xe5b   :  { %v1810_v17 = vsel %vm346_vm4, %v1806_v56, 0.0 }
 0xe5c   :  { %1811 = vadd.xlane.f32.xlu1 %v1810_v17  ;;  %v1807_v63 = vsel %vm346_vm4, %v1805_v28, 0.0 }
 0xe5d   :  { %1808 = vadd.xlane.f32.xlu0 %v1807_v63 }
 0xe6d   :  { %1826 = vperm.xlu1 %2595, %v3398_v30  }
 0xe71   :  { %2596 = vset.pattern.permute.xlu1 %v2677_v29 }
 0xe72   :  { %1832 = vperm.xlu1 %2596, %v3403_v62  }
 0xe73   :  { %1822 = vperm.xlu0 %2594, %v3403_v62  }
 0xe76   :  { %1836 = vperm.xlu1 %2596, %v3398_v30  }
 0xe77   :  { %2628 = vset.pattern.permute.xlu0 %v2674_v6 }
 0xe7a   :  { %2627 = vset.pattern.permute.xlu1 %v2674_v6 }
 0xee9   :  { %v1812_v57 = vpop.xlane.xlu1 %1811 }
 0xeea   :  { %v1814_v3 = vmul.f32 0.035714287, %v1812_v57  ;;  %v1809_v1 = vpop.xlane.xlu0 %1808  ;;  %v1872_v57 = vld [vmem:[%s3484_s11] sm:$0x7] }
 0xeeb   :  { %v1813_v31 = vmul.f32 0.035714287, %v1809_v1 }
 0xeec   :  { %v1816_v32 = vadd.f32 1e-05, %v1814_v3 }
 0xeed   :  { %v1815_v59 = vadd.f32 1e-05, %v1813_v31  ;;  %v1827_v33 = vpop.permute.xlu1 %1826 }
 0xeee   :  { %2665 = vrsqrt.f32 %v1816_v32 }
 0xeef   :  { %2667 = vrsqrt.f32 %v1815_v59 }
 0xef1   :  { %v1833_v29 = vpop.permute.xlu1 %1832 }
 0xef2   :  { %v1823_v62 = vpop.permute.xlu0 %1822 }
 0xef5   :  { %v1837_v40 = vpop.permute.xlu1 %1836 }
 0xef8   :  { %v2666_v34 = vpop.eup %2665 }
 0xef9   :  { %v2668_v37 = vpop.eup %2667  ;;  %v1820_v38 = vmul.f32 %v2666_v34, %v1804_v24 }
 0xefa   :  { %v1819_v39 = vmul.f32 %v2668_v37, %v1803_v55 }
 0xefb   :  { %v1830_v30 = vmul.f32 %v1827_v33, %v1820_v38 }
 0xefc   :  { %v1829_v20 = vmul.f32 %v1823_v62, %v1819_v39 }
 0xefd   :  { %v1840_v41 = vadd.f32 %v1837_v40, %v1830_v30 }
 0xefe   :  { %v1839_v6 = vadd.f32 %v1833_v29, %v1829_v20 }
 0xeff   :  { %vm1842_vm1 = vcmp.ge.f32.partialorder %v1840_v41, 0.0  ;;  %v1844_v42 = vmul.f32 0.2, %v1840_v41 }
 0xf00   :  { %vm1841_vm4 = vcmp.ge.f32.partialorder %v1839_v6, 0.0  ;;  %v1843_v43 = vmul.f32 0.2, %v1839_v6 }
 0xf01   :  { %v1846_v46 = vsel %vm1842_vm1, %v1840_v41, %v1844_v42 }
 0xf02   :  { %v1845_v4 = vsel %vm1841_vm4, %v1839_v6, %v1843_v43 }
 0xf03   :  { %v2597_v5 = vpack.i.bf16 %v1846_v46, %v1845_v4 }
 0xf05   :  { %2598 = vrot.lane.b32.xlu1 %v2597_v5, %s2679_s18 }
 0xf09   :  { %2603 = vrot.lane.b32.xlu1 %v2597_v5, %s2678_s5 }
 0xf77   :  { %v2599_v58 = vpop.permute.xlu1 %2598 }
 0xf78   :  { %v2601_v8 = vunpack.i.h.bf16 %v2599_v58  ;;  %v2600_v0 = vunpack.i.l.bf16 %v2599_v58 }
 0xf7a   :  { %v1862_v2 = vsel %vm1182_vm3, 0.0, %v2601_v8  ;;  %v1861_v22 = vsel %vm1182_vm3, 0.0, %v2600_v0 }
 0xf7b   :  { %v1864_v35 = vsel %vm51_vm0, %v1862_v2, 0.0  ;;  %v1863_v10 = vsel %vm51_vm0, %v1861_v22, 0.0  ;;  %v2604_v12 = vpop.permute.xlu1 %2603 }
 0xf7c   :  { %v1866_v44 = vsel %vm1626_vm12, %v1864_v35, 0.0  ;;  %v1865_v13 = vsel %vm1626_vm12, %v1863_v10, 0.0  ;;  %v2606_v45 = vunpack.i.h.bf16 %v2604_v12  ;;  %v2605_v14 = vunpack.i.l.bf16 %v2604_v12 }
 0xf7e   :  { %v1867_v15 = vsel %vm916_vm2, %v1865_v13, %v2605_v14  ;;  %v1868_v16 = vsel %vm916_vm2, %v1866_v44, %v2606_v45  ;;  %vm1984_vm2 = vcmask 124928  }
 0xf7f   :  { %v1870_v61 = vsel %vm1869_vm14, %v1867_v15, 0.0  ;;  %v1871_v25 = vsel %vm1869_vm14, %v1868_v16, 0.0 }
 0xf80   :  { %v2622_v48 = vpack.i.bf16 %v1871_v25, %v1870_v61 }
 0xf82   :  { %2623 = vrot.lane.b32.xlu0 %v2622_v48, %s2673_s19  ;;  %2608 = vrot.lane.b32.xlu1 %v2622_v48, %s2672_s0 }
 0xf86   :  { %2613 = vrot.lane.b32.xlu1 %v2622_v48, %s2671_s14  ;;  %s2683_s14 = smov 112  }
 0xf8a   :  { %2618 = vrot.lane.b32.xlu1 %v2622_v48, %s2670_s30 }
 0xf8e   :  { %1908 = vperm.xlu1 %2627, %v1873_v51  }
 0xff4   :  { %v2609_v52 = vpop.permute.xlu1 %2608  ;;  %v2624_v27 = vpop.permute.xlu0 %2623 }
 0xff5   :  { %v2611_v26 = vunpack.i.h.bf16 %v2609_v52  ;;  %v2610_v18 = vunpack.i.l.bf16 %v2609_v52  ;;  %v2626_v54 = vunpack.i.h.bf16 %v2624_v27  ;;  %v2625_v60 = vunpack.i.l.bf16 %v2624_v27 }
 0xff7   :  { %v1883_v19 = vsel %vm51_vm0, %v1871_v25, %v2611_v26  ;;  %v1882_v49 = vsel %vm51_vm0, %v1870_v61, %v2610_v18  ;;  %v1905_v28 = vsel %vm51_vm0, %v2611_v26, %v2626_v54  ;;  %v1904_v17 = vsel %vm51_vm0, %v2610_v18, %v2625_v60 }
 0xff8   :  { %v2294_v53 = vpack.c.bf16 %v1883_v19, %v1882_v49  ;;  %v2614_v9 = vpop.permute.xlu1 %2613  ;;  %v2300_v63 = vpack.c.bf16 %v1905_v28, %v1904_v17 }
 0xff9   :  { %v2616_v11 = vunpack.i.h.bf16 %v2614_v9  ;;  %v2615_v36 = vunpack.i.l.bf16 %v2614_v9 }
 0xffa   :  { %2295 = vmatpush3.bf16.msra.mxu0 %v2294_v53 }
 0xffb   :  { %2296 = vmatprep.subr.bf16.mxu0 %v2680_v7 }
 0xffc   :  { %v2619_v21 = vpop.permute.xlu1 %2618 }
 0xffd   :  { %v2621_v50 = vunpack.i.h.bf16 %v2619_v21  ;;  %v2620_v23 = vunpack.i.l.bf16 %v2619_v21 }
 0xfff   :  { %v1896_v24 = vsel %vm51_vm0, %v2615_v36, %v2620_v23  ;;  %v1897_v55 = vsel %vm51_vm0, %v2616_v11, %v2621_v50 }
0x1000   :  { %v2297_v56 = vpack.c.bf16 %v1897_v55, %v1896_v24 }
0x1002   :  { %2298 = vmatpush3.bf16.msra.mxu0 %v2297_v56 }
0x1003   :  { %2299 = vmatprep.subr.bf16.mxu0 %v2680_v7 }
0x1006   :  { %2301 = vmatpush3.bf16.msra.mxu0 %v2300_v63 }
0x1009   :  { %2195 = vmatmul.mubr.msk.f32.vlgmr.msra.gmra.mrb[12].mxu0 %vm461_vm7, %v1872_v57 }
0x100d   :  { %v1909_v3 = vpop.permute.xlu1 %1908 }
0x10dc   :  { %v1980_v1 = vpop.f32.mrb[12].mxu0 }
0x10dd   :  { %v1981_v31 = vadd.f32 %v1980_v1, %v1909_v3  ;;  %v2196_v32 = vpop.f32.mrb[13].mxu0 }
0x10df   :  { %1987 = vrot.lane.b32.xlu0 %v1981_v31, %s2683_s14  ;;  %1985 = vst.msk [vmem:[%s3485_s13] sm:$0x7] %vm1984_vm2, %v1981_v31 }
0x1151   :  { %v1988_v7 = vpop.permute.xlu0 %1987 }
0x1152   :  { %2025 = vst.msk [vmem:[%s3485_s13 + $0x4] sm:$0x7] %vm1984_vm2, %v1988_v7 }

</bundles_post_ra>
